<compile_context>
chip_gen: v5e
topology: v5e:2x2
jax: 0.10.0
libtpu: 0.0.40
codegen_flags: <defaults>
</compile_context>

<pallas_src>
import jax
import jax.numpy as jnp
from jax import lax
from jax.experimental import pallas as pl
from jax.experimental.pallas import tpu as pltpu


def blur3d_kernel(x_ref, o_ref):
    """Separable [1,2,1]^3 / 64 blur with replicate padding.

    Block layout: (TBC, D, H, W); H -> sublanes, W -> lanes.
    """
    _, D, H, W = x_ref.shape
    f32 = jnp.float32
    plane_shape = (x_ref.shape[0], H, W)

    # Edge masks for the H / W passes, hoisted out of the depth loop
    # (JAX does not CSE broadcast_in_dim).
    if H > 1:
        h_idx = lax.broadcasted_iota(jnp.int32, plane_shape, 1)
        h_first, h_last = h_idx == 0, h_idx == H - 1
    if W > 1:
        w_idx = lax.broadcasted_iota(jnp.int32, plane_shape, 2)
        w_first, w_last = w_idx == 0, w_idx == W - 1

    def blur_h(p):  # [1,2,1] along sublanes (axis=1), replicate edges, unscaled
        if H == 1:
            return p * 4.0
        left = jnp.where(h_first, p, pltpu.roll(p, shift=1, axis=1))
        right = jnp.where(h_last, p, pltpu.roll(p, shift=H - 1, axis=1))
        return left + p + p + right

    def blur_w(p):  # [1,2,1] along lanes (axis=2), replicate edges, unscaled
        if W == 1:
            return p * 4.0
        left = jnp.where(w_first, p, pltpu.roll(p, shift=1, axis=2))
        right = jnp.where(w_last, p, pltpu.roll(p, shift=W - 1, axis=2))
        return left + p + p + right

    # Streaming 3-plane window along D: each plane is read exactly once.
    # (Static unroll over the block's depth; for very large D prefer a second
    #  grid axis over D with a +/-1 halo instead.)
    mid = x_ref[:, 0].astype(f32)
    lo = mid                                   # replicate pad at d = -1
    for d in range(D):
        hi = x_ref[:, d + 1].astype(f32) if d + 1 < D else mid  # replicate at d = D
        plane = lo + mid + mid + hi            # D pass (unscaled)
        plane = blur_w(blur_h(plane))          # H, W passes (unscaled)
        # Single fused normalization: (1/4)^3 = 1/64 (kernel sum).
        o_ref[:, d] = (plane * (1.0 / 64.0)).astype(o_ref.dtype)
        lo, mid = mid, hi


def blur3d(x, *, block_bc=None, interpret=False):
    """x: (B, C, D, H, W). Depthwise [1,2,1]^(x)3 / 64 blur, replicate padding."""
    B, C, D, H, W = x.shape
    BC = B * C
    xr = x.reshape(BC, D, H, W)   # fuse batch & channel: filter is identical per channel

    # Budget in the *compute* dtype (f32): the kernel upcasts internally.
    plane_f32_bytes = D * H * W * 4
    if block_bc is None:
        # ~4 MiB of f32 per input block. With double-buffered input + output
        # pipeline buffers (~16 MiB) plus ~3 live planes of in-kernel
        # temporaries this stays well under the 48 MiB limit below and under
        # v7x's 64 MiB physical VMEM, while amortizing the ~0.35 us/step cost.
        target_bytes = 4 * 1024 * 1024
        block_bc = max(1, min(BC, target_bytes // max(1, plane_f32_bytes)))
    block_bc = int(max(1, min(block_bc, BC)))

    # Ragged last tile (BC % block_bc != 0) is safe: rows along BC never mix and
    # Pallas drops out-of-range writes.  This avoids the old pathological
    # "block_bc -> 1" divisibility fallback for prime BC.
    grid = (pl.cdiv(BC, block_bc),)

    # TODO(synk): on v7x consider pltpu.CORE_PARALLEL (or an explicit core_map
    # leading axis) so the BC grid axis provably shards across both TensorCores.
    out = pl.pallas_call(
        blur3d_kernel,
        out_shape=jax.ShapeDtypeStruct((BC, D, H, W), x.dtype),
        grid=grid,
        in_specs=[pl.BlockSpec((block_bc, D, H, W), lambda i: (i, 0, 0, 0))],
        out_specs=pl.BlockSpec((block_bc, D, H, W), lambda i: (i, 0, 0, 0)),
        compiler_params=pltpu.CompilerParams(
            dimension_semantics=(pltpu.PARALLEL,),
            vmem_limit_bytes=48 * 1024 * 1024,
        ),
        interpret=interpret,
    )(xr)
    return out.reshape(B, C, D, H, W)


if __name__ == "__main__":
    # Small demo shapes; W=128 keeps the output lane-dense (full vst stores).
    B, C, D, H, W = 2, 4, 8, 16, 128

    key = jax.random.PRNGKey(0)
    x = jax.random.normal(key, (B, C, D, H, W), dtype=jnp.float32)

    # block_bc=2 -> 4 grid steps: exercises the pipelined / parallel grid path.
    out = blur3d(x, block_bc=2)
    out = jax.block_until_ready(out)

    # Pure-JAX reference of kornia.filter3d(K, normalized=True) with the
    # filter3d default border_type='replicate'.
    f1 = jnp.array([1.0, 2.0, 1.0], dtype=jnp.float32)
    k = f1[:, None, None] * f1[None, :, None] * f1[None, None, :]
    k = k / jnp.sum(k)
    xp = jnp.pad(x, ((0, 0), (0, 0), (1, 1), (1, 1), (1, 1)), mode="edge")
    ref = lax.conv_general_dilated(
        xp.reshape(B * C, 1, D + 2, H + 2, W + 2),
        k[None, None, :, :, :],
        window_strides=(1, 1, 1),
        padding="VALID",
        dimension_numbers=("NCDHW", "OIDHW", "NCDHW"),
    ).reshape(B, C, D, H, W)

    assert out.shape == (B, C, D, H, W)
    assert jnp.allclose(out, ref, atol=1e-5, rtol=1e-5), "mismatch vs reference"

    print("KERNEL_OK")
</pallas_src>

<mosaic_0001>
module attributes {stable_mosaic.version = 11 : i64} {
  func.func @blur3d_kernel(%arg0: i32, %arg1: memref<2x8x16x128xf32, #tpu.memory_space<vmem>>, %arg2: memref<2x8x16x128xf32, #tpu.memory_space<vmem>>) attributes {dimension_semantics = [#tpu.dimension_semantics<parallel>], iteration_bounds = array<i64: 4>, scalar_prefetch = 0 : i64, scratch_operands = 0 : i64, tpu.core_type = #tpu.core_type<tc>, window_params = [{transform_indices = @transform_0, window_bounds = array<i64: 2, 8, 16, 128>}, {transform_indices = @transform_1, window_bounds = array<i64: 2, 8, 16, 128>}]} {
    %0 = tpu.iota {dimensions = array<i32: 1>} : vector<2x16x128xi32>
    %c0_i32 = arith.constant 0 : i32
    %1 = vector.broadcast %c0_i32 : i32 to vector<2x16x128xi32>
    %2 = arith.cmpi eq, %0, %1 : vector<2x16x128xi32>
    %c15_i32 = arith.constant 15 : i32
    %3 = vector.broadcast %c15_i32 : i32 to vector<2x16x128xi32>
    %4 = arith.cmpi eq, %0, %3 : vector<2x16x128xi32>
    %5 = tpu.iota {dimensions = array<i32: 2>} : vector<2x16x128xi32>
    %c0_i32_0 = arith.constant 0 : i32
    %6 = vector.broadcast %c0_i32_0 : i32 to vector<2x16x128xi32>
    %7 = arith.cmpi eq, %5, %6 : vector<2x16x128xi32>
    %c127_i32 = arith.constant 127 : i32
    %8 = vector.broadcast %c127_i32 : i32 to vector<2x16x128xi32>
    %9 = arith.cmpi eq, %5, %8 : vector<2x16x128xi32>
    %c0 = arith.constant 0 : index
    %c0_1 = arith.constant 0 : index
    %c0_2 = arith.constant 0 : index
    %c0_3 = arith.constant 0 : index
    %10 = vector.load %arg1[%c0, %c0_1, %c0_2, %c0_3] : memref<2x8x16x128xf32, #tpu.memory_space<vmem>>, vector<2x1x16x128xf32>
    %11 = vector.shape_cast %10 : vector<2x1x16x128xf32> to vector<2x16x128xf32>
    %c0_4 = arith.constant 0 : index
    %c1 = arith.constant 1 : index
    %c0_5 = arith.constant 0 : index
    %c0_6 = arith.constant 0 : index
    %12 = vector.load %arg1[%c0_4, %c1, %c0_5, %c0_6] : memref<2x8x16x128xf32, #tpu.memory_space<vmem>>, vector<2x1x16x128xf32>
    %13 = vector.shape_cast %12 : vector<2x1x16x128xf32> to vector<2x16x128xf32>
    %14 = arith.addf %11, %11 : vector<2x16x128xf32>
    %15 = arith.addf %14, %11 : vector<2x16x128xf32>
    %16 = arith.addf %15, %13 : vector<2x16x128xf32>
    %c1_i32 = arith.constant 1 : i32
    %17 = tpu.dynamic_rotate %16 by %c1_i32 dim 1 : vector<2x16x128xf32>, i32 -> vector<2x16x128xf32>
    %18 = arith.select %2, %16, %17 : vector<2x16x128xi1>, vector<2x16x128xf32>
    %c15_i32_7 = arith.constant 15 : i32
    %19 = tpu.dynamic_rotate %16 by %c15_i32_7 dim 1 : vector<2x16x128xf32>, i32 -> vector<2x16x128xf32>
    %20 = arith.select %4, %16, %19 : vector<2x16x128xi1>, vector<2x16x128xf32>
    %21 = arith.addf %18, %16 : vector<2x16x128xf32>
    %22 = arith.addf %21, %16 : vector<2x16x128xf32>
    %23 = arith.addf %22, %20 : vector<2x16x128xf32>
    %c1_i32_8 = arith.constant 1 : i32
    %24 = tpu.dynamic_rotate %23 by %c1_i32_8 dim 2 : vector<2x16x128xf32>, i32 -> vector<2x16x128xf32>
    %25 = arith.select %7, %23, %24 : vector<2x16x128xi1>, vector<2x16x128xf32>
    %c127_i32_9 = arith.constant 127 : i32
    %26 = tpu.dynamic_rotate %23 by %c127_i32_9 dim 2 : vector<2x16x128xf32>, i32 -> vector<2x16x128xf32>
    %27 = arith.select %9, %23, %26 : vector<2x16x128xi1>, vector<2x16x128xf32>
    %28 = arith.addf %25, %23 : vector<2x16x128xf32>
    %29 = arith.addf %28, %23 : vector<2x16x128xf32>
    %30 = arith.addf %29, %27 : vector<2x16x128xf32>
    %cst = arith.constant 1.562500e-02 : f32
    %31 = vector.broadcast %cst : f32 to vector<2x16x128xf32>
    %32 = arith.mulf %30, %31 : vector<2x16x128xf32>
    %c0_10 = arith.constant 0 : index
    %c0_11 = arith.constant 0 : index
    %c0_12 = arith.constant 0 : index
    %c0_13 = arith.constant 0 : index
    %33 = vector.load %arg2[%c0_10, %c0_11, %c0_12, %c0_13] : memref<2x8x16x128xf32, #tpu.memory_space<vmem>>, vector<2x1x16x128xf32>
    %34 = vector.shape_cast %33 : vector<2x1x16x128xf32> to vector<2x16x128xf32>
    %35 = vector.shape_cast %32 : vector<2x16x128xf32> to vector<2x1x16x128xf32>
    tpu.vector_store %arg2[%c0_10, %c0_11, %c0_12, %c0_13], %35 {strides = array<i32>} : memref<2x8x16x128xf32, #tpu.memory_space<vmem>>, vector<2x1x16x128xf32>,
    %c0_14 = arith.constant 0 : index
    %c2 = arith.constant 2 : index
    %c0_15 = arith.constant 0 : index
    %c0_16 = arith.constant 0 : index
    %36 = vector.load %arg1[%c0_14, %c2, %c0_15, %c0_16] : memref<2x8x16x128xf32, #tpu.memory_space<vmem>>, vector<2x1x16x128xf32>
    %37 = vector.shape_cast %36 : vector<2x1x16x128xf32> to vector<2x16x128xf32>
    %38 = arith.addf %11, %13 : vector<2x16x128xf32>
    %39 = arith.addf %38, %13 : vector<2x16x128xf32>
    %40 = arith.addf %39, %37 : vector<2x16x128xf32>
    %c1_i32_17 = arith.constant 1 : i32
    %41 = tpu.dynamic_rotate %40 by %c1_i32_17 dim 1 : vector<2x16x128xf32>, i32 -> vector<2x16x128xf32>
    %42 = arith.select %2, %40, %41 : vector<2x16x128xi1>, vector<2x16x128xf32>
    %c15_i32_18 = arith.constant 15 : i32
    %43 = tpu.dynamic_rotate %40 by %c15_i32_18 dim 1 : vector<2x16x128xf32>, i32 -> vector<2x16x128xf32>
    %44 = arith.select %4, %40, %43 : vector<2x16x128xi1>, vector<2x16x128xf32>
    %45 = arith.addf %42, %40 : vector<2x16x128xf32>
    %46 = arith.addf %45, %40 : vector<2x16x128xf32>
    %47 = arith.addf %46, %44 : vector<2x16x128xf32>
    %c1_i32_19 = arith.constant 1 : i32
    %48 = tpu.dynamic_rotate %47 by %c1_i32_19 dim 2 : vector<2x16x128xf32>, i32 -> vector<2x16x128xf32>
    %49 = arith.select %7, %47, %48 : vector<2x16x128xi1>, vector<2x16x128xf32>
    %c127_i32_20 = arith.constant 127 : i32
    %50 = tpu.dynamic_rotate %47 by %c127_i32_20 dim 2 : vector<2x16x128xf32>, i32 -> vector<2x16x128xf32>
    %51 = arith.select %9, %47, %50 : vector<2x16x128xi1>, vector<2x16x128xf32>
    %52 = arith.addf %49, %47 : vector<2x16x128xf32>
    %53 = arith.addf %52, %47 : vector<2x16x128xf32>
    %54 = arith.addf %53, %51 : vector<2x16x128xf32>
    %cst_21 = arith.constant 1.562500e-02 : f32
    %55 = vector.broadcast %cst_21 : f32 to vector<2x16x128xf32>
    %56 = arith.mulf %54, %55 : vector<2x16x128xf32>
    %c0_22 = arith.constant 0 : index
    %c1_23 = arith.constant 1 : index
    %c0_24 = arith.constant 0 : index
    %c0_25 = arith.constant 0 : index
    %57 = vector.load %arg2[%c0_22, %c1_23, %c0_24, %c0_25] : memref<2x8x16x128xf32, #tpu.memory_space<vmem>>, vector<2x1x16x128xf32>
    %58 = vector.shape_cast %57 : vector<2x1x16x128xf32> to vector<2x16x128xf32>
    %59 = vector.shape_cast %56 : vector<2x16x128xf32> to vector<2x1x16x128xf32>
    tpu.vector_store %arg2[%c0_22, %c1_23, %c0_24, %c0_25], %59 {strides = array<i32>} : memref<2x8x16x128xf32, #tpu.memory_space<vmem>>, vector<2x1x16x128xf32>,
    %c0_26 = arith.constant 0 : index
    %c3 = arith.constant 3 : index
    %c0_27 = arith.constant 0 : index
    %c0_28 = arith.constant 0 : index
    %60 = vector.load %arg1[%c0_26, %c3, %c0_27, %c0_28] : memref<2x8x16x128xf32, #tpu.memory_space<vmem>>, vector<2x1x16x128xf32>
    %61 = vector.shape_cast %60 : vector<2x1x16x128xf32> to vector<2x16x128xf32>
    %62 = arith.addf %13, %37 : vector<2x16x128xf32>
    %63 = arith.addf %62, %37 : vector<2x16x128xf32>
    %64 = arith.addf %63, %61 : vector<2x16x128xf32>
    %c1_i32_29 = arith.constant 1 : i32
    %65 = tpu.dynamic_rotate %64 by %c1_i32_29 dim 1 : vector<2x16x128xf32>, i32 -> vector<2x16x128xf32>
    %66 = arith.select %2, %64, %65 : vector<2x16x128xi1>, vector<2x16x128xf32>
    %c15_i32_30 = arith.constant 15 : i32
    %67 = tpu.dynamic_rotate %64 by %c15_i32_30 dim 1 : vector<2x16x128xf32>, i32 -> vector<2x16x128xf32>
    %68 = arith.select %4, %64, %67 : vector<2x16x128xi1>, vector<2x16x128xf32>
    %69 = arith.addf %66, %64 : vector<2x16x128xf32>
    %70 = arith.addf %69, %64 : vector<2x16x128xf32>
    %71 = arith.addf %70, %68 : vector<2x16x128xf32>
    %c1_i32_31 = arith.constant 1 : i32
    %72 = tpu.dynamic_rotate %71 by %c1_i32_31 dim 2 : vector<2x16x128xf32>, i32 -> vector<2x16x128xf32>
    %73 = arith.select %7, %71, %72 : vector<2x16x128xi1>, vector<2x16x128xf32>
    %c127_i32_32 = arith.constant 127 : i32
    %74 = tpu.dynamic_rotate %71 by %c127_i32_32 dim 2 : vector<2x16x128xf32>, i32 -> vector<2x16x128xf32>
    %75 = arith.select %9, %71, %74 : vector<2x16x128xi1>, vector<2x16x128xf32>
    %76 = arith.addf %73, %71 : vector<2x16x128xf32>
    %77 = arith.addf %76, %71 : vector<2x16x128xf32>
    %78 = arith.addf %77, %75 : vector<2x16x128xf32>
    %cst_33 = arith.constant 1.562500e-02 : f32
    %79 = vector.broadcast %cst_33 : f32 to vector<2x16x128xf32>
    %80 = arith.mulf %78, %79 : vector<2x16x128xf32>
    %c0_34 = arith.constant 0 : index
    %c2_35 = arith.constant 2 : index
    %c0_36 = arith.constant 0 : index
    %c0_37 = arith.constant 0 : index
    %81 = vector.load %arg2[%c0_34, %c2_35, %c0_36, %c0_37] : memref<2x8x16x128xf32, #tpu.memory_space<vmem>>, vector<2x1x16x128xf32>
    %82 = vector.shape_cast %81 : vector<2x1x16x128xf32> to vector<2x16x128xf32>
    %83 = vector.shape_cast %80 : vector<2x16x128xf32> to vector<2x1x16x128xf32>
    tpu.vector_store %arg2[%c0_34, %c2_35, %c0_36, %c0_37], %83 {strides = array<i32>} : memref<2x8x16x128xf32, #tpu.memory_space<vmem>>, vector<2x1x16x128xf32>,
    %c0_38 = arith.constant 0 : index
    %c4 = arith.constant 4 : index
    %c0_39 = arith.constant 0 : index
    %c0_40 = arith.constant 0 : index
    %84 = vector.load %arg1[%c0_38, %c4, %c0_39, %c0_40] : memref<2x8x16x128xf32, #tpu.memory_space<vmem>>, vector<2x1x16x128xf32>
    %85 = vector.shape_cast %84 : vector<2x1x16x128xf32> to vector<2x16x128xf32>
    %86 = arith.addf %37, %61 : vector<2x16x128xf32>
    %87 = arith.addf %86, %61 : vector<2x16x128xf32>
    %88 = arith.addf %87, %85 : vector<2x16x128xf32>
    %c1_i32_41 = arith.constant 1 : i32
    %89 = tpu.dynamic_rotate %88 by %c1_i32_41 dim 1 : vector<2x16x128xf32>, i32 -> vector<2x16x128xf32>
    %90 = arith.select %2, %88, %89 : vector<2x16x128xi1>, vector<2x16x128xf32>
    %c15_i32_42 = arith.constant 15 : i32
    %91 = tpu.dynamic_rotate %88 by %c15_i32_42 dim 1 : vector<2x16x128xf32>, i32 -> vector<2x16x128xf32>
    %92 = arith.select %4, %88, %91 : vector<2x16x128xi1>, vector<2x16x128xf32>
    %93 = arith.addf %90, %88 : vector<2x16x128xf32>
    %94 = arith.addf %93, %88 : vector<2x16x128xf32>
    %95 = arith.addf %94, %92 : vector<2x16x128xf32>
    %c1_i32_43 = arith.constant 1 : i32
    %96 = tpu.dynamic_rotate %95 by %c1_i32_43 dim 2 : vector<2x16x128xf32>, i32 -> vector<2x16x128xf32>
    %97 = arith.select %7, %95, %96 : vector<2x16x128xi1>, vector<2x16x128xf32>
    %c127_i32_44 = arith.constant 127 : i32
    %98 = tpu.dynamic_rotate %95 by %c127_i32_44 dim 2 : vector<2x16x128xf32>, i32 -> vector<2x16x128xf32>
    %99 = arith.select %9, %95, %98 : vector<2x16x128xi1>, vector<2x16x128xf32>
    %100 = arith.addf %97, %95 : vector<2x16x128xf32>
    %101 = arith.addf %100, %95 : vector<2x16x128xf32>
    %102 = arith.addf %101, %99 : vector<2x16x128xf32>
    %cst_45 = arith.constant 1.562500e-02 : f32
    %103 = vector.broadcast %cst_45 : f32 to vector<2x16x128xf32>
    %104 = arith.mulf %102, %103 : vector<2x16x128xf32>
    %c0_46 = arith.constant 0 : index
    %c3_47 = arith.constant 3 : index
    %c0_48 = arith.constant 0 : index
    %c0_49 = arith.constant 0 : index
    %105 = vector.load %arg2[%c0_46, %c3_47, %c0_48, %c0_49] : memref<2x8x16x128xf32, #tpu.memory_space<vmem>>, vector<2x1x16x128xf32>
    %106 = vector.shape_cast %105 : vector<2x1x16x128xf32> to vector<2x16x128xf32>
    %107 = vector.shape_cast %104 : vector<2x16x128xf32> to vector<2x1x16x128xf32>
    tpu.vector_store %arg2[%c0_46, %c3_47, %c0_48, %c0_49], %107 {strides = array<i32>} : memref<2x8x16x128xf32, #tpu.memory_space<vmem>>, vector<2x1x16x128xf32>,
    %c0_50 = arith.constant 0 : index
    %c5 = arith.constant 5 : index
    %c0_51 = arith.constant 0 : index
    %c0_52 = arith.constant 0 : index
    %108 = vector.load %arg1[%c0_50, %c5, %c0_51, %c0_52] : memref<2x8x16x128xf32, #tpu.memory_space<vmem>>, vector<2x1x16x128xf32>
    %109 = vector.shape_cast %108 : vector<2x1x16x128xf32> to vector<2x16x128xf32>
    %110 = arith.addf %61, %85 : vector<2x16x128xf32>
    %111 = arith.addf %110, %85 : vector<2x16x128xf32>
    %112 = arith.addf %111, %109 : vector<2x16x128xf32>
    %c1_i32_53 = arith.constant 1 : i32
    %113 = tpu.dynamic_rotate %112 by %c1_i32_53 dim 1 : vector<2x16x128xf32>, i32 -> vector<2x16x128xf32>
    %114 = arith.select %2, %112, %113 : vector<2x16x128xi1>, vector<2x16x128xf32>
    %c15_i32_54 = arith.constant 15 : i32
    %115 = tpu.dynamic_rotate %112 by %c15_i32_54 dim 1 : vector<2x16x128xf32>, i32 -> vector<2x16x128xf32>
    %116 = arith.select %4, %112, %115 : vector<2x16x128xi1>, vector<2x16x128xf32>
    %117 = arith.addf %114, %112 : vector<2x16x128xf32>
    %118 = arith.addf %117, %112 : vector<2x16x128xf32>
    %119 = arith.addf %118, %116 : vector<2x16x128xf32>
    %c1_i32_55 = arith.constant 1 : i32
    %120 = tpu.dynamic_rotate %119 by %c1_i32_55 dim 2 : vector<2x16x128xf32>, i32 -> vector<2x16x128xf32>
    %121 = arith.select %7, %119, %120 : vector<2x16x128xi1>, vector<2x16x128xf32>
    %c127_i32_56 = arith.constant 127 : i32
    %122 = tpu.dynamic_rotate %119 by %c127_i32_56 dim 2 : vector<2x16x128xf32>, i32 -> vector<2x16x128xf32>
    %123 = arith.select %9, %119, %122 : vector<2x16x128xi1>, vector<2x16x128xf32>
    %124 = arith.addf %121, %119 : vector<2x16x128xf32>
    %125 = arith.addf %124, %119 : vector<2x16x128xf32>
    %126 = arith.addf %125, %123 : vector<2x16x128xf32>
    %cst_57 = arith.constant 1.562500e-02 : f32
    %127 = vector.broadcast %cst_57 : f32 to vector<2x16x128xf32>
    %128 = arith.mulf %126, %127 : vector<2x16x128xf32>
    %c0_58 = arith.constant 0 : index
    %c4_59 = arith.constant 4 : index
    %c0_60 = arith.constant 0 : index
    %c0_61 = arith.constant 0 : index
    %129 = vector.load %arg2[%c0_58, %c4_59, %c0_60, %c0_61] : memref<2x8x16x128xf32, #tpu.memory_space<vmem>>, vector<2x1x16x128xf32>
    %130 = vector.shape_cast %129 : vector<2x1x16x128xf32> to vector<2x16x128xf32>
    %131 = vector.shape_cast %128 : vector<2x16x128xf32> to vector<2x1x16x128xf32>
    tpu.vector_store %arg2[%c0_58, %c4_59, %c0_60, %c0_61], %131 {strides = array<i32>} : memref<2x8x16x128xf32, #tpu.memory_space<vmem>>, vector<2x1x16x128xf32>,
    %c0_62 = arith.constant 0 : index
    %c6 = arith.constant 6 : index
    %c0_63 = arith.constant 0 : index
    %c0_64 = arith.constant 0 : index
    %132 = vector.load %arg1[%c0_62, %c6, %c0_63, %c0_64] : memref<2x8x16x128xf32, #tpu.memory_space<vmem>>, vector<2x1x16x128xf32>
    %133 = vector.shape_cast %132 : vector<2x1x16x128xf32> to vector<2x16x128xf32>
    %134 = arith.addf %85, %109 : vector<2x16x128xf32>
    %135 = arith.addf %134, %109 : vector<2x16x128xf32>
    %136 = arith.addf %135, %133 : vector<2x16x128xf32>
    %c1_i32_65 = arith.constant 1 : i32
    %137 = tpu.dynamic_rotate %136 by %c1_i32_65 dim 1 : vector<2x16x128xf32>, i32 -> vector<2x16x128xf32>
    %138 = arith.select %2, %136, %137 : vector<2x16x128xi1>, vector<2x16x128xf32>
    %c15_i32_66 = arith.constant 15 : i32
    %139 = tpu.dynamic_rotate %136 by %c15_i32_66 dim 1 : vector<2x16x128xf32>, i32 -> vector<2x16x128xf32>
    %140 = arith.select %4, %136, %139 : vector<2x16x128xi1>, vector<2x16x128xf32>
    %141 = arith.addf %138, %136 : vector<2x16x128xf32>
    %142 = arith.addf %141, %136 : vector<2x16x128xf32>
    %143 = arith.addf %142, %140 : vector<2x16x128xf32>
    %c1_i32_67 = arith.constant 1 : i32
    %144 = tpu.dynamic_rotate %143 by %c1_i32_67 dim 2 : vector<2x16x128xf32>, i32 -> vector<2x16x128xf32>
    %145 = arith.select %7, %143, %144 : vector<2x16x128xi1>, vector<2x16x128xf32>
    %c127_i32_68 = arith.constant 127 : i32
    %146 = tpu.dynamic_rotate %143 by %c127_i32_68 dim 2 : vector<2x16x128xf32>, i32 -> vector<2x16x128xf32>
    %147 = arith.select %9, %143, %146 : vector<2x16x128xi1>, vector<2x16x128xf32>
    %148 = arith.addf %145, %143 : vector<2x16x128xf32>
    %149 = arith.addf %148, %143 : vector<2x16x128xf32>
    %150 = arith.addf %149, %147 : vector<2x16x128xf32>
    %cst_69 = arith.constant 1.562500e-02 : f32
    %151 = vector.broadcast %cst_69 : f32 to vector<2x16x128xf32>
    %152 = arith.mulf %150, %151 : vector<2x16x128xf32>
    %c0_70 = arith.constant 0 : index
    %c5_71 = arith.constant 5 : index
    %c0_72 = arith.constant 0 : index
    %c0_73 = arith.constant 0 : index
    %153 = vector.load %arg2[%c0_70, %c5_71, %c0_72, %c0_73] : memref<2x8x16x128xf32, #tpu.memory_space<vmem>>, vector<2x1x16x128xf32>
    %154 = vector.shape_cast %153 : vector<2x1x16x128xf32> to vector<2x16x128xf32>
    %155 = vector.shape_cast %152 : vector<2x16x128xf32> to vector<2x1x16x128xf32>
    tpu.vector_store %arg2[%c0_70, %c5_71, %c0_72, %c0_73], %155 {strides = array<i32>} : memref<2x8x16x128xf32, #tpu.memory_space<vmem>>, vector<2x1x16x128xf32>,
    %c0_74 = arith.constant 0 : index
    %c7 = arith.constant 7 : index
    %c0_75 = arith.constant 0 : index
    %c0_76 = arith.constant 0 : index
    %156 = vector.load %arg1[%c0_74, %c7, %c0_75, %c0_76] : memref<2x8x16x128xf32, #tpu.memory_space<vmem>>, vector<2x1x16x128xf32>
    %157 = vector.shape_cast %156 : vector<2x1x16x128xf32> to vector<2x16x128xf32>
    %158 = arith.addf %109, %133 : vector<2x16x128xf32>
    %159 = arith.addf %158, %133 : vector<2x16x128xf32>
    %160 = arith.addf %159, %157 : vector<2x16x128xf32>
    %c1_i32_77 = arith.constant 1 : i32
    %161 = tpu.dynamic_rotate %160 by %c1_i32_77 dim 1 : vector<2x16x128xf32>, i32 -> vector<2x16x128xf32>
    %162 = arith.select %2, %160, %161 : vector<2x16x128xi1>, vector<2x16x128xf32>
    %c15_i32_78 = arith.constant 15 : i32
    %163 = tpu.dynamic_rotate %160 by %c15_i32_78 dim 1 : vector<2x16x128xf32>, i32 -> vector<2x16x128xf32>
    %164 = arith.select %4, %160, %163 : vector<2x16x128xi1>, vector<2x16x128xf32>
    %165 = arith.addf %162, %160 : vector<2x16x128xf32>
    %166 = arith.addf %165, %160 : vector<2x16x128xf32>
    %167 = arith.addf %166, %164 : vector<2x16x128xf32>
    %c1_i32_79 = arith.constant 1 : i32
    %168 = tpu.dynamic_rotate %167 by %c1_i32_79 dim 2 : vector<2x16x128xf32>, i32 -> vector<2x16x128xf32>
    %169 = arith.select %7, %167, %168 : vector<2x16x128xi1>, vector<2x16x128xf32>
    %c127_i32_80 = arith.constant 127 : i32
    %170 = tpu.dynamic_rotate %167 by %c127_i32_80 dim 2 : vector<2x16x128xf32>, i32 -> vector<2x16x128xf32>
    %171 = arith.select %9, %167, %170 : vector<2x16x128xi1>, vector<2x16x128xf32>
    %172 = arith.addf %169, %167 : vector<2x16x128xf32>
    %173 = arith.addf %172, %167 : vector<2x16x128xf32>
    %174 = arith.addf %173, %171 : vector<2x16x128xf32>
    %cst_81 = arith.constant 1.562500e-02 : f32
    %175 = vector.broadcast %cst_81 : f32 to vector<2x16x128xf32>
    %176 = arith.mulf %174, %175 : vector<2x16x128xf32>
    %c0_82 = arith.constant 0 : index
    %c6_83 = arith.constant 6 : index
    %c0_84 = arith.constant 0 : index
    %c0_85 = arith.constant 0 : index
    %177 = vector.load %arg2[%c0_82, %c6_83, %c0_84, %c0_85] : memref<2x8x16x128xf32, #tpu.memory_space<vmem>>, vector<2x1x16x128xf32>
    %178 = vector.shape_cast %177 : vector<2x1x16x128xf32> to vector<2x16x128xf32>
    %179 = vector.shape_cast %176 : vector<2x16x128xf32> to vector<2x1x16x128xf32>
    tpu.vector_store %arg2[%c0_82, %c6_83, %c0_84, %c0_85], %179 {strides = array<i32>} : memref<2x8x16x128xf32, #tpu.memory_space<vmem>>, vector<2x1x16x128xf32>,
    %180 = arith.addf %133, %157 : vector<2x16x128xf32>
    %181 = arith.addf %180, %157 : vector<2x16x128xf32>
    %182 = arith.addf %181, %157 : vector<2x16x128xf32>
    %c1_i32_86 = arith.constant 1 : i32
    %183 = tpu.dynamic_rotate %182 by %c1_i32_86 dim 1 : vector<2x16x128xf32>, i32 -> vector<2x16x128xf32>
    %184 = arith.select %2, %182, %183 : vector<2x16x128xi1>, vector<2x16x128xf32>
    %c15_i32_87 = arith.constant 15 : i32
    %185 = tpu.dynamic_rotate %182 by %c15_i32_87 dim 1 : vector<2x16x128xf32>, i32 -> vector<2x16x128xf32>
    %186 = arith.select %4, %182, %185 : vector<2x16x128xi1>, vector<2x16x128xf32>
    %187 = arith.addf %184, %182 : vector<2x16x128xf32>
    %188 = arith.addf %187, %182 : vector<2x16x128xf32>
    %189 = arith.addf %188, %186 : vector<2x16x128xf32>
    %c1_i32_88 = arith.constant 1 : i32
    %190 = tpu.dynamic_rotate %189 by %c1_i32_88 dim 2 : vector<2x16x128xf32>, i32 -> vector<2x16x128xf32>
    %191 = arith.select %7, %189, %190 : vector<2x16x128xi1>, vector<2x16x128xf32>
    %c127_i32_89 = arith.constant 127 : i32
    %192 = tpu.dynamic_rotate %189 by %c127_i32_89 dim 2 : vector<2x16x128xf32>, i32 -> vector<2x16x128xf32>
    %193 = arith.select %9, %189, %192 : vector<2x16x128xi1>, vector<2x16x128xf32>
    %194 = arith.addf %191, %189 : vector<2x16x128xf32>
    %195 = arith.addf %194, %189 : vector<2x16x128xf32>
    %196 = arith.addf %195, %193 : vector<2x16x128xf32>
    %cst_90 = arith.constant 1.562500e-02 : f32
    %197 = vector.broadcast %cst_90 : f32 to vector<2x16x128xf32>
    %198 = arith.mulf %196, %197 : vector<2x16x128xf32>
    %c0_91 = arith.constant 0 : index
    %c7_92 = arith.constant 7 : index
    %c0_93 = arith.constant 0 : index
    %c0_94 = arith.constant 0 : index
    %199 = vector.load %arg2[%c0_91, %c7_92, %c0_93, %c0_94] : memref<2x8x16x128xf32, #tpu.memory_space<vmem>>, vector<2x1x16x128xf32>
    %200 = vector.shape_cast %199 : vector<2x1x16x128xf32> to vector<2x16x128xf32>
    %201 = vector.shape_cast %198 : vector<2x16x128xf32> to vector<2x1x16x128xf32>
    tpu.vector_store %arg2[%c0_91, %c7_92, %c0_93, %c0_94], %201 {strides = array<i32>} : memref<2x8x16x128xf32, #tpu.memory_space<vmem>>, vector<2x1x16x128xf32>,
    return
  }
  func.func @transform_0(%arg0: i32) -> (i32, i32, i32, i32) {
    %c0_i32 = arith.constant 0 : i32
    %c0_i32_0 = arith.constant 0 : i32
    %c0_i32_1 = arith.constant 0 : i32
    %c0_i32_2 = arith.constant 0 : i32
    return %arg0, %c0_i32, %c0_i32_0, %c0_i32_1 : i32, i32, i32, i32
  }
  func.func @transform_1(%arg0: i32) -> (i32, i32, i32, i32) {
    %c0_i32 = arith.constant 0 : i32
    %c0_i32_0 = arith.constant 0 : i32
    %c0_i32_1 = arith.constant 0 : i32
    %c0_i32_2 = arith.constant 0 : i32
    return %arg0, %c0_i32, %c0_i32_0, %c0_i32_1 : i32, i32, i32, i32
  }
}

</mosaic_0001>

<bundles_post_ra>
// kernel: tpu_custom_call.1
= control target key start
LH: loop header
LB: loop body
LE: loop exit
PB: predicated region body
PF: predicated region fallthrough
CT: control target
= control target key end

     0   :  { %6 = vsyncpa [#allocation3], 0  ;;  %s2393_s0 = inlined_call_operand.hbm [shape: f32[8,8,16,128], index: 0, kind: input, shape index: {}]   ;;  %s2394_s1 = inlined_call_operand.hbm [shape: f32[8,8,16,128], index: 1, kind: output, shape index: {}]  }
   0x1   :  { %8 = vsyncpa [#allocation3 + $0x1], 0 }
   0x2   :  { %9 = vsyncpa [#allocation4], 0 }
   0x3   :  { %11 = vsyncpa [#allocation4 + $0x1], 0  ;;  %s1267_s6 = smov 0   ;;  %s1269_s7 = smov 0  }
   0x4   :  { %s1271_s8 = smov 0   ;;  %s1273_s9 = smov 0  }
   0x5 LB: > { %s1288_s10 = sadd.s32 4294967295, %s1249_s9   ;;  %s1025_s11 = sadd.s32 4294967294, %s1249_s9   ;;  %s1249_s9 = sphi %s1273_s9, %s2403_s9   ;;  %s1245_s8 = sphi %s1271_s8, %s2402_s8   ;;  %s1241_s7 = sphi %s1269_s7, %s2401_s7   ;;  %s1237_s6 = sphi %s1267_s6, %s2400_s6  }
   0x6   : > { %s1292_s12 = sadd.s32 1, %s1249_s9   ;;  %s24_s13 = sadd.s32 1, %s1245_s8 }
   0x7   : > { %s21_s14 = ssub.s32 %s1249_s9, %s1292_s12  ;;  %p31_p0 = scmp.ne.s32.totalorder %s1245_s8, %s1241_s7 }
   0x8   : > { %p22_p1 = scmp.eq.s32.totalorder %s21_s14, 0  ;;  %p32_p2 = scmp.eq.s32.totalorder %s1249_s9, 0 }
   0x9   : > { %p37_p3 = scmp.ne.s32.totalorder %s1241_s7, %s1237_s6  ;;  %p38_p4 = scmp.eq.s32.totalorder %s1288_s10, 0 }
   0xa   : > { %s1304_s15 = scalar_select %p22_p1, %s1245_s8, %s24_s13  }
   0xb   : > { %p1306_p5 = por %p32_p2, %p31_p0  ;;  %p1310_p6 = por %p38_p4, %p37_p3 }
   0xc   : > { %p61_p7 = scmp.eq.s32.totalorder %s1288_s10, 3  ;;  %p67_p8 = scmp.eq.s32.totalorder %s1025_s11, 3 }
   0xd   : > { %p1113_p9 = scmp.lt.s32.totalorder %s1249_s9, 4  ;;  %s87_s20 = sand.u32 1, %s1245_s8  }
   0xe   : > { %p1316_p10 = por %p61_p7, %p31_p0  ;;  %p1320_p11 = por %p67_p8, %p37_p3 }
   0xf   : > { %s1098_s21 = sshll.u32 %s1249_s9, 8  ;;  %s1028_s22 = sshll.u32 %s87_s20, 8 }
  0x10   : > { %s97_s25 = scalar_lea.hbm %s2393_s0, %s1098_s21  ;;  %s91_s27 = scalar_lea.vmem [#allocation2], %s1028_s22 }
  0x11   : > { %s98_s26 = sshll.u32 %s97_s25, 4  ;;  %s100_s28 = sshll.u32 %s91_s27, 4  ;;  %s99_s26 = int_to_ptr.hbm [resolvable:$true] %s98_s26  ;;  %s101_s28 = int_to_ptr.vmem [resolvable:$true] %s100_s28 }
  0x12   : > { %p1331_p12 = pnand %p1113_p9, %p1306_p5  ;;  %p1032_p13 = scmp.ge.s32.totalorder %s1249_s9, 1 }
  0x13   : > { %p108_p0 = scmp.lt.s32.totalorder %s1249_s9, 5  ;;  %s88_s30 = scalar_lea.sflag [#allocation3], %s87_s20 }
  0x14   : > { %s1153_s2 = sshra.s32 %s99_s26, 4  ;;  %p1157_p2 = pneg %p1331_p12  ;;  %s1154_s2 = int_to_ptr.hbm [resolvable:$true] %s1153_s2 }
  0x15   : > { %s1155_s3 = scalar_lea.hbm %s1154_s2, 256  ;;  %s1160_s11 = scalar_lea.hbm %s2393_s0, 1024 }
  0x16   : > { %p1156_p1 = scmp.ne.s32.totalorder %s1154_s2, %s1155_s3  ;;  %p1161_p5 = scmp.lt.s32.totalorder %s1154_s2, %s2393_s0 }
  0x17   : > { %p1162_p7 = scmp.lt.s32.totalorder %s1160_s11, %s1155_s3 }
  0x18   : > { %p1158_p3 = pnand %p1157_p2, %p1156_p1 }
  0x19   : > { %p1163_p8 = por %p1162_p7, %p1161_p5 }
  0x1a   : > { %p1159_p4 = pneg %p1158_p3 }
  0x1c   : > { %p1164_p9 = pnand %p1163_p8, %p1159_p4 }
  0x1e   : > { %1167 = shalt.err (!%p1164_p9)
}
  0x1f   : > { %s1251_s16 = smov 128   ;;  %s1252_s20 = smov 8  }
  0x20   : > { %1108 = dma.hbm_to_vmem [thread:$0]  (!%p1331_p12), %s99_s26, 4096, %s101_s28, %s88_s30, %s1251_s16, %s1251_s16, %s1252_s20  }
  0x21   : > { %p109_p1 = pnand %p1032_p13, %p108_p0 }
  0x22   : > { %s1352_s21 = sand.u32 (!%p109_p1), 1, %s1241_s7  }
  0x23   : > { %112 = sbr.rel (%p109_p1) target bundleno = 351 (0x15f), region = 24  ;;  %s1033_s22 = sshll.u32 (!%p109_p1), %s1352_s21, 8 }
  0x24   : > { %s115_s23 = scalar_lea.sflag (!%p109_p1), [#allocation3], %s1352_s21  ;;  %s1358_s24 = scalar_lea.vmem (!%p109_p1), [#allocation2], %s1033_s22 }
  0x28   : > { %1228 = dma.done.wait (%p1310_p6), %s115_s23, 4096  }
  0x29   : > { %1230 = vsyncadd (%p1310_p6), %s115_s23, 4294963200  ;;  %v140_v0 = vlaneseq  ;;  %v153_v3 = vld [vmem:[%s1358_s24 + $0x80] sm:$0xff]  ;;  %v154_v4 = vld [vmem:[%s1358_s24 + $0x88] sm:$0xff]  ;;  %s1253_s17 = smov 1   ;;  %s1254_s25 = smov 127  }
  0x2a   : > { %v1373_v5 = vld [vmem:[%s1358_s24 + $0x90] sm:$0xff]  ;;  %v162_v6 = vadd.f32 %v153_v3, %v153_v3  ;;  %v163_v7 = vadd.f32 %v154_v4, %v154_v4  ;;  %v151_v8 = vld [vmem:[%s1358_s24] sm:$0xff]  ;;  %v152_v9 = vld [vmem:[%s1358_s24 + $0x8] sm:$0xff]  ;;  %s1995_s26 = scalar_lea.vmem [#allocation5], %s1033_s22  ;;  %s1100_s27 = sshll.u32 %s1288_s10, 8 }
  0x2b   : > { %v1365_v1 = vshrl.u32 %v140_v0, 7  ;;  %v1378_v10 = vld [vmem:[%s1358_s24 + $0x98] sm:$0xff]  ;;  %v1382_v11 = vld [vmem:[%s1358_s24 + $0x10] sm:$0xff]  ;;  %v160_v13 = vadd.f32 %v151_v8, %v151_v8  ;;  %v161_v14 = vadd.f32 %v152_v9, %v152_v9  ;;  %v261_v15 = vadd.f32 %v1373_v5, %v153_v3  ;;  %v1407_v28 = vld [vmem:[%s1358_s24 + $0x20] sm:$0xff]  ;;  %s948_s30 = scalar_lea.hbm %s2394_s1, %s1100_s27  ;;  %s949_s2 = sshll.u32 %s1995_s26, 4  ;;  %s950_s2 = int_to_ptr.vmem [resolvable:$true] %s949_s2 }
  0x2c   : > { %v1385_v12 = vld [vmem:[%s1358_s24 + $0x18] sm:$0xff]  ;;  %v166_v16 = vadd.f32 %v162_v6, %v153_v3  ;;  %v167_v17 = vadd.f32 %v163_v7, %v154_v4  ;;  %v259_v18 = vadd.f32 %v1382_v11, %v151_v8  ;;  %v1410_v29 = vld [vmem:[%s1358_s24 + $0x28] sm:$0xff]  ;;  %v262_v30 = vadd.f32 %v1378_v10, %v154_v4  ;;  %v1442_v47 = vld [vmem:[%s1358_s24 + $0xa0] sm:$0xff]  ;;  %s951_s3 = sshll.u32 %s948_s30, 4  ;;  %s936_s10 = scalar_lea.sflag [#allocation4], %s1352_s21  ;;  %s952_s3 = int_to_ptr.hbm [resolvable:$true] %s951_s3 }
  0x2d   : > { %v1368_v2 = vadd.s32 8, %v1365_v1  ;;  %vm176_vm0 = vcmp.lt.s32.totalorder %v1365_v1, 1  ;;  %v260_v19 = vadd.f32 %v1385_v12, %v152_v9  ;;  %vm189_vm2 = vcmp.lt.s32.totalorder %v1365_v1, 7  ;;  %v1461_v59 = vld [vmem:[%s1358_s24 + $0xa8] sm:$0xff]  ;;  %s1197_s4 = sshra.s32 %s952_s3, 4  ;;  %s1203_s14 = scalar_lea.hbm %s2394_s1, 1024  ;;  %s1198_s4 = int_to_ptr.hbm [resolvable:$true] %s1197_s4 }
  0x2e   : > { %v164_v20 = vadd.f32 %v160_v13, %v151_v8  ;;  %v165_v21 = vadd.f32 %v161_v14, %v152_v9  ;;  %v1393_v22 = vadd.f32 %v1373_v5, %v166_v16  ;;  %v1396_v23 = vadd.f32 %v1378_v10, %v167_v17  ;;  %s1199_s5 = scalar_lea.hbm %s1198_s4, 256  ;;  %p1204_p0 = scmp.lt.s32.totalorder %s1198_s4, %s2394_s1 }
  0x2f   : > { %vm146_vm1 = vcmp.eq.s32.totalorder %v1368_v2, 15  ;;  %v263_v24 = vadd.f32 %v1382_v11, %v259_v18  ;;  %v264_v25 = vadd.f32 %v1385_v12, %v260_v19  ;;  %v265_v31 = vadd.f32 %v1373_v5, %v261_v15  ;;  %p1200_p6 = scmp.ne.s32.totalorder %s1198_s4, %s1199_s5  ;;  %p1205_p2 = scmp.lt.s32.totalorder %s1203_s14, %s1199_s5 }
  0x30   : > { %v1401_v26 = vadd.f32 %v1382_v11, %v164_v20  ;;  %v1404_v27 = vadd.f32 %v1385_v12, %v165_v21  ;;  %v173_v32 = vrot.slane %v1393_v22, 7  ;;  %v175_v33 = vrot.slane %v1396_v23, 7 }
  0x31   : > { %v186_v34 = vrot.slane %v1393_v22, 1  ;;  %v188_v35 = vrot.slane %v1396_v23, 1  ;;  %v1429_v42 = vadd.f32 %v1407_v28, %v263_v24  ;;  %v1432_v43 = vadd.f32 %v1410_v29, %v264_v25  ;;  %p1201_p12 = pnand %p1200_p6, %p1316_p10  ;;  %p1206_p3 = por %p1205_p2, %p1204_p0 }
  0x32   : > { %v172_v36 = vrot.slane %v1401_v26, 7  ;;  %v174_v37 = vrot.slane %v1404_v27, 7  ;;  %v185_v38 = vrot.slane %v1401_v26, 1  ;;  %v187_v39 = vrot.slane %v1404_v27, 1 }
  0x33   : > { %v178_v40 = vsel %vm176_vm0, %v173_v32, %v175_v33  ;;  %v193_v41 = vsel %vm189_vm2, %v188_v35, %v186_v34  ;;  %v266_v48 = vadd.f32 %v1378_v10, %v262_v30  ;;  %v271_v51 = vrot.slane %v1429_v42, 7  ;;  %p1202_p13 = pneg %p1201_p12 }
  0x34   : > { %v201_v44 = vadd.f32 %v178_v40, %v1396_v23  ;;  %v177_v45 = vsel %vm176_vm0, %v172_v36, %v174_v37  ;;  %v192_v46 = vsel %vm189_vm2, %v187_v39, %v185_v38  ;;  %v197_v49 = vsel %vm146_vm1, %v1396_v23, %v193_v41 }
  0x35   : > { %v199_v50 = vadd.f32 %v177_v45, %v1404_v27  ;;  %v273_v52 = vrot.slane %v1432_v43, 7  ;;  %v195_v54 = vsel %vm146_vm1, %v1404_v27, %v192_v46  ;;  %v283_v55 = vrot.slane %v1429_v42, 1  ;;  %p1207_p4 = pnand %p1206_p3, %p1202_p13 }
  0x36   : > { %v205_v53 = vadd.f32 %v201_v44, %v1396_v23  ;;  %v285_v56 = vrot.slane %v1432_v43, 1  ;;  %v269_v60 = vadd.f32 %v1442_v47, %v265_v31  ;;  %vm143_vm3 = vcmp.eq.s32.totalorder %v1365_v1, 0 }
  0x37   : > { %v203_v57 = vadd.f32 %v199_v50, %v1404_v27  ;;  %v275_v58 = vsel %vm176_vm0, %v271_v51, %v273_v52  ;;  %v180_v63 = vsel %vm176_vm0, %v175_v33, %v173_v32  ;;  %v179_v6 = vsel %vm176_vm0, %v174_v37, %v172_v36 }
  0x38   : > { %v1464_v61 = vadd.f32 %v205_v53, %v197_v49  ;;  %v296_v62 = vadd.f32 %v275_v58, %v1432_v43  ;;  %v289_v4 = vsel %vm189_vm2, %v285_v56, %v283_v55  ;;  %v270_v7 = vadd.f32 %v1461_v59, %v266_v48 }
  0x39   : > { %v1470_v3 = vadd.f32 %v203_v57, %v195_v54  ;;  %v183_v9 = vsel %vm143_vm3, %v1393_v22, %v180_v63  ;;  %v272_v13 = vrot.slane %v269_v60, 7  ;;  %v284_v14 = vrot.slane %v269_v60, 1  ;;  %v1573_v63 = vld [vmem:[%s1358_s24 + $0xb8] sm:$0xff] }
  0x3a   : > { %216 = vrot.lane.b32.xlu1 %v1464_v61, %s1253_s17  ;;  %v300_v8 = vadd.f32 %v296_v62, %v1432_v43  ;;  %v292_v15 = vsel %vm146_vm1, %v1432_v43, %v289_v4  ;;  %v181_v16 = vsel %vm143_vm3, %v1401_v26, %v179_v6  ;;  %v274_v17 = vrot.slane %v270_v7, 7 }
  0x3b   : > { %212 = vrot.lane.b32.xlu0 %v1470_v3, %s1253_s17  ;;  %224 = vrot.lane.b32.xlu2 %v1470_v3, %s1254_s25  ;;  %v286_v18 = vrot.slane %v270_v7, 1  ;;  %v200_v19 = vadd.f32 %v183_v9, %v1393_v22  ;;  %v198_v24 = vadd.f32 %v181_v16, %v1401_v26  ;;  %v358_v27 = vadd.f32 %v1410_v29, %v1385_v12 }
  0x3c   : > { %v276_v20 = vsel %vm176_vm0, %v272_v13, %v274_v17  ;;  %v1502_v23 = vadd.f32 %v300_v8, %v292_v15  ;;  %v278_v31 = vsel %vm176_vm0, %v274_v17, %v272_v13  ;;  %v357_v32 = vadd.f32 %v1407_v28, %v1382_v11 }
  0x3d   : > { %v290_v21 = vsel %vm189_vm2, %v286_v18, %v284_v14  ;;  %v298_v25 = vadd.f32 %v276_v20, %v270_v7  ;;  %v204_v36 = vadd.f32 %v200_v19, %v1393_v22  ;;  %v191_v12 = vsel %vm189_vm2, %v186_v34, %v188_v35  ;;  %v1538_v34 = vld [vmem:[%s1358_s24 + $0x30] sm:$0xff]  ;;  %v1541_v35 = vld [vmem:[%s1358_s24 + $0x38] sm:$0xff] }
  0x3e   : > { %v294_v30 = vsel %vm146_vm1, %v270_v7, %v290_v21  ;;  %v202_v37 = vadd.f32 %v198_v24, %v1401_v26  ;;  %v281_v11 = vsel %vm143_vm3, %v269_v60, %v278_v31  ;;  %v190_v41 = vsel %vm189_vm2, %v185_v38, %v187_v39 }
  0x3f   : > { %v302_v33 = vadd.f32 %v298_v25, %v270_v7  ;;  %v361_v44 = vadd.f32 %v1407_v28, %v357_v32  ;;  %v362_v45 = vadd.f32 %v1410_v29, %v358_v27  ;;  %v277_v22 = vsel %vm176_vm0, %v273_v52, %v271_v51 }
  0x40   : > { %v1543_v46 = vadd.f32 %v204_v36, %v191_v12  ;;  %v297_v26 = vadd.f32 %v281_v11, %v269_v60  ;;  %v1545_v48 = vadd.f32 %v202_v37, %v190_v41  ;;  %v279_v38 = vsel %vm143_vm3, %v1429_v42, %v277_v22  ;;  %v1629_v41 = vld [vmem:[%s1358_s24 + $0x40] sm:$0xff] }
  0x41   : > { %v1523_v40 = vadd.f32 %v302_v33, %v294_v30  ;;  %v365_v39 = vadd.f32 %v1538_v34, %v361_v44  ;;  %v366_v49 = vadd.f32 %v1541_v35, %v362_v45  ;;  %v359_v50 = vadd.f32 %v1442_v47, %v1373_v5  ;;  %v1632_v45 = vld [vmem:[%s1358_s24 + $0x48] sm:$0xff] }
  0x42   : > { %228 = vrot.lane.b32.xlu1 %v1464_v61, %s1254_s25  ;;  %v360_v51 = vadd.f32 %v1461_v59, %v1378_v10  ;;  %v301_v52 = vadd.f32 %v297_v26, %v269_v60  ;;  %v288_v53 = vsel %vm189_vm2, %v284_v14, %v286_v18  ;;  %v295_v54 = vadd.f32 %v279_v38, %v1429_v42  ;;  %v1570_v60 = vld [vmem:[%s1358_s24 + $0xb0] sm:$0xff] }
  0x43   : > { %309 = vrot.lane.b32.xlu0 %v1502_v23, %s1253_s17  ;;  %313 = vrot.lane.b32.xlu2 %v1523_v40, %s1253_s17  ;;  %v369_v57 = vrot.slane %v365_v39, 7  ;;  %v371_v58 = vrot.slane %v366_v49, 7  ;;  %v363_v5 = vadd.f32 %v1442_v47, %v359_v50  ;;  %v287_v6 = vsel %vm189_vm2, %v283_v55, %v285_v56 }
  0x44   : > { %v364_v10 = vadd.f32 %v1461_v59, %v360_v51  ;;  %v1567_v62 = vadd.f32 %v301_v52, %v288_v53  ;;  %v299_v4 = vadd.f32 %v295_v54, %v1429_v42  ;;  %v381_v15 = vrot.slane %v365_v39, 1  ;;  %v1645_v51 = vld [vmem:[%s1358_s24 + $0xc0] sm:$0xff]  ;;  %v1648_v52 = vld [vmem:[%s1358_s24 + $0xc8] sm:$0xff] }
  0x45   : > { %v375_v7 = vsel %vm176_vm0, %v371_v58, %v369_v57  ;;  %v367_v8 = vadd.f32 %v1570_v60, %v363_v5  ;;  %v373_v56 = vsel %vm176_vm0, %v369_v57, %v371_v58  ;;  %v383_v16 = vrot.slane %v366_v49, 1 }
  0x46   : > { %v368_v9 = vadd.f32 %v1573_v63, %v364_v10  ;;  %v1590_v13 = vadd.f32 %v299_v4, %v287_v6  ;;  %v377_v42 = vsel %vm143_vm3, %v365_v39, %v375_v7  ;;  %v394_v17 = vadd.f32 %v373_v56, %v366_v49 }
  0x47   : > { %v370_v43 = vrot.slane %v367_v8, 7  ;;  %v393_v14 = vadd.f32 %v377_v42, %v365_v39  ;;  %v455_v18 = vadd.f32 %v1538_v34, %v1407_v28  ;;  %v387_v20 = vsel %vm189_vm2, %v383_v16, %v381_v15 }
  0x48   : > { %v372_v55 = vrot.slane %v368_v9, 7  ;;  %v456_v21 = vadd.f32 %v1541_v35, %v1410_v29  ;;  %v385_v28 = vsel %vm189_vm2, %v381_v15, %v383_v16  ;;  %v382_v27 = vrot.slane %v367_v8, 1 }
  0x49   : > { %v397_v24 = vadd.f32 %v393_v14, %v365_v39  ;;  %v384_v30 = vrot.slane %v368_v9, 1  ;;  %v390_v31 = vsel %vm146_vm1, %v366_v49, %v387_v20  ;;  %v398_v32 = vadd.f32 %v394_v17, %v366_v49 }
  0x4a   : > { %214 = vrot.lane.b32.xlu1 %v1543_v46, %s1253_s17  ;;  %v376_v19 = vsel %vm176_vm0, %v372_v55, %v370_v43  ;;  %v374_v25 = vsel %vm176_vm0, %v370_v43, %v372_v55  ;;  %v459_v33 = vadd.f32 %v1538_v34, %v455_v18  ;;  %v460_v36 = vadd.f32 %v1541_v35, %v456_v21 }
  0x4b   : > { %210 = vrot.lane.b32.xlu0 %v1545_v48, %s1253_s17  ;;  %222 = vrot.lane.b32.xlu2 %v1545_v48, %s1254_s25  ;;  %v379_v29 = vsel %vm143_vm3, %v367_v8, %v376_v19  ;;  %v457_v12 = vadd.f32 %v1570_v60, %v1442_v47  ;;  %v458_v37 = vadd.f32 %v1573_v63, %v1461_v59 }
  0x4c   : > { %v1626_v11 = vadd.f32 %v397_v24, %v385_v28  ;;  %v396_v44 = vadd.f32 %v374_v25, %v368_v9  ;;  %v395_v22 = vadd.f32 %v379_v29, %v367_v8  ;;  %v388_v26 = vsel %vm189_vm2, %v384_v30, %v382_v27  ;;  %v1698_v29 = vld [vmem:[%s1358_s24 + $0x58] sm:$0xff] }
  0x4d   : > { %v1636_v38 = vadd.f32 %v398_v32, %v390_v31  ;;  %v463_v39 = vadd.f32 %v1629_v41, %v459_v33  ;;  %v464_v47 = vadd.f32 %v1632_v45, %v460_v36  ;;  %v461_v49 = vadd.f32 %v1570_v60, %v457_v12 }
  0x4e   : > { %v462_v59 = vadd.f32 %v1573_v63, %v458_v37  ;;  %v400_v50 = vadd.f32 %v396_v44, %v368_v9  ;;  %v392_v53 = vsel %vm146_vm1, %v368_v9, %v388_v26  ;;  %v399_v54 = vadd.f32 %v395_v22, %v367_v8  ;;  %v1713_v22 = vld [vmem:[%s1358_s24 + $0xd0] sm:$0xff]  ;;  %v1716_v26 = vld [vmem:[%s1358_s24 + $0xd8] sm:$0xff] }
  0x4f   : > { %v386_v57 = vsel %vm189_vm2, %v382_v27, %v384_v30  ;;  %v467_v58 = vrot.slane %v463_v39, 7  ;;  %v469_v5 = vrot.slane %v464_v47, 7  ;;  %v465_v10 = vadd.f32 %v1645_v51, %v461_v49  ;;  %v1695_v30 = vld [vmem:[%s1358_s24 + $0x50] sm:$0xff] }
  0x50   : > { %v466_v4 = vadd.f32 %v1648_v52, %v462_v59  ;;  %v1660_v6 = vadd.f32 %v400_v50, %v392_v53  ;;  %v1662_v7 = vadd.f32 %v399_v54, %v386_v57  ;;  %v479_v56 = vrot.slane %v463_v39, 1 }
  0x51   : > { %v473_v9 = vsel %vm176_vm0, %v469_v5, %v467_v58  ;;  %v468_v8 = vrot.slane %v465_v10, 7  ;;  %v471_v43 = vsel %vm176_vm0, %v467_v58, %v469_v5  ;;  %v481_v14 = vrot.slane %v464_v47, 1 }
  0x52   : > { %311 = vrot.lane.b32.xlu1 %v1567_v62, %s1253_s17  ;;  %v470_v42 = vrot.slane %v466_v4, 7  ;;  %v475_v15 = vsel %vm143_vm3, %v463_v39, %v473_v9  ;;  %v553_v16 = vadd.f32 %v1629_v41, %v1538_v34  ;;  %v554_v17 = vadd.f32 %v1632_v45, %v1541_v35 }
  0x53   : > { %226 = vrot.lane.b32.xlu0 %v1543_v46, %s1254_s25  ;;  %307 = vrot.lane.b32.xlu2 %v1590_v13, %s1253_s17  ;;  %v492_v18 = vadd.f32 %v471_v43, %v464_v47  ;;  %v491_v20 = vadd.f32 %v475_v15, %v463_v39  ;;  %v485_v21 = vsel %vm189_vm2, %v481_v14, %v479_v56  ;;  %v480_v33 = vrot.slane %v465_v10, 1 }
  0x54   : > { %v474_v55 = vsel %vm176_vm0, %v470_v42, %v468_v8  ;;  %v556_v24 = vadd.f32 %v1648_v52, %v1573_v63  ;;  %v555_v34 = vadd.f32 %v1645_v51, %v1570_v60  ;;  %v557_v25 = vadd.f32 %v1629_v41, %v553_v16 }
  0x55   : > { %v477_v19 = vsel %vm143_vm3, %v465_v10, %v474_v55  ;;  %v558_v27 = vadd.f32 %v1632_v45, %v554_v17  ;;  %v496_v35 = vadd.f32 %v492_v18, %v464_v47  ;;  %v488_v60 = vsel %vm146_vm1, %v464_v47, %v485_v21 }
  0x56   : > { %v493_v28 = vadd.f32 %v477_v19, %v465_v10  ;;  %v483_v63 = vsel %vm189_vm2, %v479_v56, %v481_v14  ;;  %v495_v31 = vadd.f32 %v491_v20, %v463_v39  ;;  %v472_v32 = vsel %vm176_vm0, %v468_v8, %v470_v42 }
  0x57   : > { %v482_v36 = vrot.slane %v466_v4, 1  ;;  %v559_v12 = vadd.f32 %v1645_v51, %v555_v34  ;;  %v560_v37 = vadd.f32 %v1648_v52, %v556_v24  ;;  %v561_v47 = vadd.f32 %v1695_v30, %v557_v25  ;;  %v1768_v25 = vld [vmem:[%s1358_s24 + $0x68] sm:$0xff] }
  0x58   : > { %v497_v44 = vadd.f32 %v493_v28, %v465_v10  ;;  %v562_v39 = vadd.f32 %v1698_v29, %v558_v27  ;;  %v1720_v49 = vadd.f32 %v496_v35, %v488_v60  ;;  %v1724_v50 = vadd.f32 %v495_v31, %v483_v63  ;;  %v1765_v28 = vld [vmem:[%s1358_s24 + $0x60] sm:$0xff] }
  0x59   : > { %v484_v59 = vsel %vm189_vm2, %v480_v33, %v482_v36  ;;  %v494_v53 = vadd.f32 %v472_v32, %v466_v4  ;;  %v563_v54 = vadd.f32 %v1713_v22, %v559_v12  ;;  %v564_v57 = vadd.f32 %v1716_v26, %v560_v37 }
  0x5a   : > { %321 = vrot.lane.b32.xlu1 %v1502_v23, %s1254_s25  ;;  %v486_v58 = vsel %vm189_vm2, %v482_v36, %v480_v33  ;;  %v1730_v5 = vadd.f32 %v497_v44, %v484_v59  ;;  %v565_v10 = vrot.slane %v561_v47, 7  ;;  %v567_v9 = vrot.slane %v562_v39, 7 }
  0x5b   : > { %319 = vrot.lane.b32.xlu0 %v1590_v13, %s1254_s25  ;;  %323 = vrot.lane.b32.xlu2 %v1567_v62, %s1254_s25  ;;  %v498_v8 = vadd.f32 %v494_v53, %v466_v4  ;;  %v490_v43 = vsel %vm146_vm1, %v466_v4, %v486_v58  ;;  %v566_v55 = vrot.slane %v563_v54, 7  ;;  %v568_v56 = vrot.slane %v564_v57, 7 }
  0x5c   : > { %v571_v42 = vsel %vm176_vm0, %v567_v9, %v565_v10  ;;  %v652_v17 = vadd.f32 %v1698_v29, %v1632_v45  ;;  %v651_v4 = vadd.f32 %v1695_v30, %v1629_v41  ;;  %v569_v20 = vsel %vm176_vm0, %v565_v10, %v567_v9 }
  0x5d   : > { %v573_v14 = vsel %vm143_vm3, %v561_v47, %v571_v42  ;;  %v1744_v15 = vadd.f32 %v498_v8, %v490_v43  ;;  %v572_v16 = vsel %vm176_vm0, %v568_v56, %v566_v55  ;;  %v577_v21 = vrot.slane %v561_v47, 1 }
  0x5e   : > { %v589_v18 = vadd.f32 %v573_v14, %v561_v47  ;;  %v575_v19 = vsel %vm143_vm3, %v563_v54, %v572_v16  ;;  %v579_v24 = vrot.slane %v562_v39, 1  ;;  %v655_v45 = vadd.f32 %v1695_v30, %v651_v4  ;;  %v1806_v16 = vld [vmem:[%s1358_s24 + $0xe8] sm:$0xff] }
  0x5f   : > { %v656_v34 = vadd.f32 %v1698_v29, %v652_v17  ;;  %v591_v27 = vadd.f32 %v575_v19, %v563_v54  ;;  %v570_v60 = vsel %vm176_vm0, %v566_v55, %v568_v56  ;;  %v578_v63 = vrot.slane %v563_v54, 1  ;;  %v1801_v56 = vld [vmem:[%s1358_s24 + $0xe0] sm:$0xff] }
  0x60   : > { %v593_v41 = vadd.f32 %v589_v18, %v561_v47  ;;  %v581_v35 = vsel %vm189_vm2, %v577_v21, %v579_v24  ;;  %v580_v31 = vrot.slane %v564_v57, 1  ;;  %v590_v32 = vadd.f32 %v569_v20, %v562_v39 }
  0x61   : > { %v653_v33 = vadd.f32 %v1713_v22, %v1645_v51  ;;  %v659_v36 = vadd.f32 %v1765_v28, %v655_v45  ;;  %v660_v12 = vadd.f32 %v1768_v25, %v656_v34  ;;  %v583_v37 = vsel %vm189_vm2, %v579_v24, %v577_v21 }
  0x62   : > { %405 = vrot.lane.b32.xlu1 %v1626_v11, %s1253_s17  ;;  %v1780_v44 = vadd.f32 %v593_v41, %v581_v35  ;;  %v592_v47 = vadd.f32 %v570_v60, %v564_v57  ;;  %v654_v59 = vadd.f32 %v1716_v26, %v1648_v52  ;;  %v595_v53 = vadd.f32 %v591_v27, %v563_v54 }
  0x63   : > { %325 = vrot.lane.b32.xlu0 %v1523_v40, %s1254_s25  ;;  %407 = vrot.lane.b32.xlu2 %v1636_v38, %s1253_s17  ;;  %v582_v51 = vsel %vm189_vm2, %v578_v63, %v580_v31  ;;  %v594_v58 = vadd.f32 %v590_v32, %v562_v39  ;;  %v584_v10 = vsel %vm189_vm2, %v580_v31, %v578_v63  ;;  %v663_v8 = vrot.slane %v659_v36, 7 }
  0x64   : > { %v586_v9 = vsel %vm146_vm1, %v562_v39, %v583_v37  ;;  %v665_v52 = vrot.slane %v660_v12, 7  ;;  %v596_v42 = vadd.f32 %v592_v47, %v564_v57  ;;  %v657_v54 = vadd.f32 %v1713_v22, %v653_v33 }
  0x65   : > { %v658_v43 = vadd.f32 %v1716_v26, %v654_v59  ;;  %v1798_v55 = vadd.f32 %v595_v53, %v582_v51  ;;  %v588_v14 = vsel %vm146_vm1, %v564_v57, %v584_v10  ;;  %v1808_v39 = vadd.f32 %v594_v58, %v586_v9  ;;  %v1079_v58 = vld [vmem:[%s1358_s24 + $0x70] sm:$0xff] }
  0x66   : > { %v669_v17 = vsel %vm176_vm0, %v665_v52, %v663_v8  ;;  %v1812_v4 = vadd.f32 %v596_v42, %v588_v14  ;;  %v661_v18 = vadd.f32 %v1801_v56, %v657_v54  ;;  %v675_v45 = vrot.slane %v659_v36, 1 }
  0x67   : > { %v662_v19 = vadd.f32 %v1806_v16, %v658_v43  ;;  %v671_v57 = vsel %vm143_vm3, %v659_v36, %v669_v17  ;;  %v677_v34 = vrot.slane %v660_v12, 1  ;;  %v667_v27 = vsel %vm176_vm0, %v663_v8, %v665_v52 }
  0x68   : > { %v664_v21 = vrot.slane %v661_v18, 7  ;;  %v687_v41 = vadd.f32 %v671_v57, %v659_v36  ;;  %v749_v35 = vadd.f32 %v1765_v28, %v1695_v30  ;;  %v750_v60 = vadd.f32 %v1768_v25, %v1698_v29 }
  0x69   : > { %v666_v24 = vrot.slane %v662_v19, 7  ;;  %v688_v31 = vadd.f32 %v667_v27, %v660_v12  ;;  %v679_v32 = vsel %vm189_vm2, %v675_v45, %v677_v34  ;;  %v681_v29 = vsel %vm189_vm2, %v677_v34, %v675_v45  ;;  %v1082_v27 = vld [vmem:[%s1358_s24 + $0xf8] sm:$0xff] }
  0x6a   : > { %411 = vrot.lane.b32.xlu1 %v1660_v6, %s1253_s17  ;;  %v691_v33 = vadd.f32 %v687_v41, %v659_v36  ;;  %v753_v37 = vadd.f32 %v1765_v28, %v749_v35  ;;  %v754_v47 = vadd.f32 %v1768_v25, %v750_v60  ;;  %v676_v59 = vrot.slane %v661_v18, 1  ;;  %v1080_v36 = vld [vmem:[%s1358_s24 + $0x78] sm:$0xff]  ;;  %v1081_v41 = vld [vmem:[%s1358_s24 + $0xf0] sm:$0xff] }
  0x6b   : > { %409 = vrot.lane.b32.xlu0 %v1662_v7, %s1253_s17  ;;  %417 = vrot.lane.b32.xlu2 %v1626_v11, %s1254_s25  ;;  %v670_v63 = vsel %vm176_vm0, %v666_v24, %v664_v21  ;;  %v668_v30 = vsel %vm176_vm0, %v664_v21, %v666_v24  ;;  %v678_v53 = vrot.slane %v662_v19, 1  ;;  %v751_v10 = vadd.f32 %v1801_v56, %v1713_v22 }
  0x6c   : > { %v673_v51 = vsel %vm143_vm3, %v661_v18, %v670_v63  ;;  %v692_v9 = vadd.f32 %v688_v31, %v660_v12  ;;  %v752_v8 = vadd.f32 %v1806_v16, %v1716_v26  ;;  %v1856_v52 = vadd.f32 %v691_v33, %v679_v32 }
  0x6d   : > { %v690_v42 = vadd.f32 %v668_v30, %v662_v19  ;;  %v684_v54 = vsel %vm146_vm1, %v660_v12, %v681_v29  ;;  %v689_v14 = vadd.f32 %v673_v51, %v661_v18  ;;  %v1862_v17 = vadd.f32 %v1079_v58, %v753_v37 }
  0x6e   : > { %v1864_v22 = vadd.f32 %v1080_v36, %v754_v47  ;;  %v682_v57 = vsel %vm189_vm2, %v678_v53, %v676_v59  ;;  %v843_v26 = vadd.f32 %v1080_v36, %v1768_v25  ;;  %v842_v21 = vadd.f32 %v1079_v58, %v1765_v28 }
  0x6f   : > { %v1870_v24 = vadd.f32 %v692_v9, %v684_v54  ;;  %v755_v45 = vadd.f32 %v1801_v56, %v751_v10  ;;  %v756_v12 = vadd.f32 %v1806_v16, %v752_v8  ;;  %v694_v34 = vadd.f32 %v690_v42, %v662_v19 }
  0x70   : > { %v686_v25 = vsel %vm146_vm1, %v662_v19, %v682_v57  ;;  %v693_v35 = vadd.f32 %v689_v14, %v661_v18  ;;  %v761_v28 = vrot.slane %v1862_v17, 7  ;;  %v763_v60 = vrot.slane %v1864_v22, 7 }
  0x71   : > { %v680_v63 = vsel %vm189_vm2, %v676_v59, %v678_v53  ;;  %v846_v31 = vadd.f32 %v1079_v58, %v842_v21  ;;  %v847_v32 = vadd.f32 %v1080_v36, %v843_v26  ;;  %v1888_v33 = vadd.f32 %v1081_v41, %v755_v45 }
  0x72   : > { %421 = vrot.lane.b32.xlu1 %v1662_v7, %s1254_s25  ;;  %v1890_v30 = vadd.f32 %v1082_v27, %v756_v12  ;;  %v1892_v29 = vadd.f32 %v694_v34, %v686_v25  ;;  %v1895_v18 = vand.u32 127, %v140_v0  ;;  %v1897_v19 = vadd.f32 %v693_v35, %v680_v63 }
  0x73   : > { %419 = vrot.lane.b32.xlu0 %v1636_v38, %s1254_s25  ;;  %423 = vrot.lane.b32.xlu2 %v1660_v6, %s1254_s25  ;;  %v765_v47 = vsel %vm176_vm0, %v761_v28, %v763_v60  ;;  %v767_v59 = vsel %vm176_vm0, %v763_v60, %v761_v28  ;;  %v773_v53 = vrot.slane %v1862_v17, 1  ;;  %v1906_v51 = vadd.f32 %v1079_v58, %v846_v31 }
  0x74   : > { %v1908_v10 = vadd.f32 %v1080_v36, %v847_v32  ;;  %v844_v9 = vadd.f32 %v1081_v41, %v1801_v56  ;;  %v775_v0 = vrot.slane %v1864_v22, 1  ;;  %v762_v8 = vrot.slane %v1888_v33, 7 }
  0x75   : > { %v764_v42 = vrot.slane %v1890_v30, 7  ;;  %v845_v54 = vadd.f32 %v1082_v27, %v1806_v16  ;;  %vm149_vm4 = vcmp.eq.s32.totalorder %v1895_v18, 0  ;;  %v786_v58 = vadd.f32 %v765_v47, %v1864_v22 }
  0x76   : > { %v769_v56 = vsel %vm143_vm3, %v1862_v17, %v767_v59  ;;  %v854_v16 = vrot.slane %v1906_v51, 7  ;;  %v856_v57 = vrot.slane %v1908_v10, 7  ;;  %v848_v26 = vadd.f32 %v1081_v41, %v844_v9 }
  0x77   : > { %v768_v36 = vsel %vm176_vm0, %v764_v42, %v762_v8  ;;  %vm150_vm5 = vcmp.eq.s32.totalorder %v1895_v18, 127  ;;  %v779_v12 = vsel %vm189_vm2, %v775_v0, %v773_v53  ;;  %v849_v34 = vadd.f32 %v1082_v27, %v845_v54 }
  0x78   : > { %v785_v28 = vadd.f32 %v769_v56, %v1862_v17  ;;  %v771_v60 = vsel %vm143_vm3, %v1888_v33, %v768_v36  ;;  %v790_v32 = vadd.f32 %v786_v58, %v1864_v22  ;;  %v782_v59 = vsel %vm146_vm1, %v1864_v22, %v779_v12 }
  0x79   : > { %v860_v9 = vsel %vm176_vm0, %v856_v57, %v854_v16  ;;  %v1957_v54 = vadd.f32 %v1081_v41, %v848_v26  ;;  %v787_v36 = vadd.f32 %v771_v60, %v1888_v33  ;;  %v766_v26 = vsel %vm176_vm0, %v762_v8, %v764_v42 }
  0x7a   : > { %505 = vrot.lane.b32.xlu1 %v1720_v49, %s1253_s17  ;;  %v789_v58 = vadd.f32 %v785_v28, %v1862_v17  ;;  %v1969_v22 = vadd.f32 %v790_v32, %v782_v59  ;;  %v862_v41 = vsel %vm143_vm3, %v1906_v51, %v860_v9  ;;  %v774_v17 = vrot.slane %v1888_v33, 1 }
  0x7b   : > { %503 = vrot.lane.b32.xlu0 %v1724_v50, %s1253_s17  ;;  %507 = vrot.lane.b32.xlu2 %v1730_v5, %s1253_s17  ;;  %v855_v12 = vrot.slane %v1957_v54, 7  ;;  %v878_v42 = vadd.f32 %v862_v41, %v1906_v51  ;;  %v858_v60 = vsel %vm176_vm0, %v854_v16, %v856_v57  ;;  %v868_v32 = vrot.slane %v1908_v10, 1 }
  0x82   : > { %515 = vrot.lane.b32.xlu1 %v1724_v50, %s1254_s25 }
  0x83   : > { %509 = vrot.lane.b32.xlu0 %v1744_v15, %s1253_s17  ;;  %517 = vrot.lane.b32.xlu2 %v1720_v49, %s1254_s25 }
  0x8a   : > { %521 = vrot.lane.b32.xlu1 %v1744_v15, %s1254_s25 }
  0x8b   : > { %519 = vrot.lane.b32.xlu0 %v1730_v5, %s1254_s25  ;;  %601 = vrot.lane.b32.xlu2 %v1780_v44, %s1253_s17 }
  0x92   : > { %605 = vrot.lane.b32.xlu1 %v1798_v55, %s1253_s17 }
  0x93   : > { %603 = vrot.lane.b32.xlu0 %v1808_v39, %s1253_s17  ;;  %607 = vrot.lane.b32.xlu2 %v1812_v4, %s1253_s17 }
  0x95   : > { %v1824_v20 = vpop.permute.xlu2 %224 }
  0x96   : > { %v231_v47 = vsel %vm150_vm5, %v1470_v3, %v1824_v20 }
  0x9a   : > { %615 = vrot.lane.b32.xlu1 %v1808_v39, %s1254_s25 }
  0x9b   : > { %613 = vrot.lane.b32.xlu0 %v1780_v44, %s1254_s25  ;;  %617 = vrot.lane.b32.xlu2 %v1798_v55, %s1254_s25 }
  0x9d   : > { %v1860_v43 = vpop.permute.xlu2 %313 }
  0xa2   : > { %699 = vrot.lane.b32.xlu1 %v1856_v52, %s1253_s17 }
  0xa3   : > { %619 = vrot.lane.b32.xlu0 %v1812_v4, %s1254_s25  ;;  %701 = vrot.lane.b32.xlu2 %v1870_v24, %s1253_s17 }
  0xa5   : > { %v1899_v37 = vpop.permute.xlu2 %222 }
  0xaa   : > { %705 = vrot.lane.b32.xlu1 %v1892_v29, %s1253_s17 }
  0xab   : > { %703 = vrot.lane.b32.xlu0 %v1897_v19, %s1253_s17  ;;  %711 = vrot.lane.b32.xlu2 %v1856_v52, %s1254_s25 }
  0xac   : > { %v217_v14 = vpop.permute.xlu1 %216 }
  0xad   : > { %v221_v21 = vsel %vm149_vm4, %v1464_v61, %v217_v14  ;;  %v213_v45 = vpop.permute.xlu0 %212  ;;  %v1945_v31 = vpop.permute.xlu2 %307  ;;  %v1961_v14 = vadd.f32 %v1082_v27, %v849_v34 }
  0xae   : > { %v237_v25 = vadd.f32 %v221_v21, %v1464_v61  ;;  %v219_v35 = vsel %vm149_vm4, %v1470_v3, %v213_v45  ;;  %v776_v45 = vrot.slane %v1890_v30, 1 }
  0xaf   : > { %v235_v63 = vadd.f32 %v219_v35, %v1470_v3  ;;  %v857_v35 = vrot.slane %v1961_v14, 7 }
  0xb0   : > { %v241_v20 = vadd.f32 %v237_v25, %v1464_v61  ;;  %v791_v25 = vadd.f32 %v787_v36, %v1888_v33  ;;  %v778_v28 = vsel %vm189_vm2, %v774_v17, %v776_v45  ;;  %v780_v9 = vsel %vm189_vm2, %v776_v45, %v774_v17 }
  0xb1   : > { %v239_v56 = vadd.f32 %v235_v63, %v1470_v3  ;;  %v777_v3 = vsel %vm189_vm2, %v773_v53, %v775_v0  ;;  %v866_v63 = vrot.slane %v1906_v51, 1  ;;  %v861_v57 = vsel %vm176_vm0, %v857_v35, %v855_v12 }
  0xb2   : > { %715 = vrot.lane.b32.xlu1 %v1897_v19, %s1254_s25  ;;  %v2005_v16 = vadd.f32 %v791_v25, %v778_v28  ;;  %v882_v36 = vadd.f32 %v878_v42, %v1906_v51  ;;  %v867_v51 = vrot.slane %v1957_v54, 1  ;;  %v864_v17 = vsel %vm143_vm3, %v1957_v54, %v861_v57 }
  0xb3   : > { %v243_v21 = vadd.f32 %v239_v56, %v231_v47  ;;  %713 = vrot.lane.b32.xlu0 %v1870_v24, %s1254_s25  ;;  %717 = vrot.lane.b32.xlu2 %v1892_v29, %s1254_s25  ;;  %v788_v47 = vadd.f32 %v766_v26, %v1890_v30  ;;  %v879_v56 = vadd.f32 %v858_v60, %v1908_v10  ;;  %v869_v26 = vrot.slane %v1961_v14, 1 }
  0xb4   : > { %v229_v27 = vpop.permute.xlu1 %228 }
  0xb5   : > { %v247_v34 = vmul.f32 0.015625, %v243_v21  ;;  %v233_v53 = vsel %vm150_vm5, %v1464_v61, %v229_v27  ;;  %v310_v0 = vpop.permute.xlu0 %309  ;;  %v1998_v61 = vadd.f32 %v789_v58, %v777_v3  ;;  %v324_v33 = vpop.permute.xlu2 %323  ;;  %v792_v58 = vadd.f32 %v788_v47, %v1890_v30 }
  0xb6   : > { %v245_v8 = vadd.f32 %v241_v20, %v233_v53  ;;  %v870_v20 = vsel %vm189_vm2, %v866_v63, %v868_v32  ;;  %v859_v21 = vsel %vm176_vm0, %v855_v12, %v857_v35  ;;  %v872_v3 = vsel %vm189_vm2, %v868_v32, %v866_v63 }
  0xb7   : > { %251 = vst [vmem:[%s1995_s26 + $0x8] sm:$0xff] %v247_v34  ;;  %v784_v27 = vsel %vm146_vm1, %v1890_v30, %v780_v9  ;;  %v883_v34 = vadd.f32 %v879_v56, %v1908_v10  ;;  %v2040_v53 = vadd.f32 %v882_v36, %v870_v20  ;;  %v881_v25 = vadd.f32 %v859_v21, %v1961_v14 }
  0xb8   : > { %v249_v59 = vmul.f32 0.015625, %v245_v8  ;;  %v875_v35 = vsel %vm146_vm1, %v1908_v10, %v872_v3  ;;  %v2048_v28 = vadd.f32 %v792_v58, %v784_v27  ;;  %v880_v63 = vadd.f32 %v864_v17, %v1957_v54 }
  0xb9   : > { %v230_v32 = vsel %vm150_vm5, %v1545_v48, %v1899_v37  ;;  %v873_v47 = vsel %vm189_vm2, %v869_v26, %v867_v51  ;;  %v885_v9 = vadd.f32 %v881_v25, %v1961_v14  ;;  %v315_v36 = vsel %vm149_vm4, %v1590_v13, %v1945_v31 }
  0xba   : > { %253 = vst [vmem:[%s1995_s26 + $0x88] sm:$0xff] %v249_v59  ;;  %799 = vrot.lane.b32.xlu1 %v1969_v22, %s1253_s17  ;;  %v2060_v59 = vadd.f32 %v883_v34, %v875_v35  ;;  %v877_v37 = vsel %vm146_vm1, %v1961_v14, %v873_v47  ;;  %v871_v58 = vsel %vm189_vm2, %v867_v51, %v869_v26 }
  0xbb   : > { %797 = vrot.lane.b32.xlu0 %v1998_v61, %s1253_s17  ;;  %801 = vrot.lane.b32.xlu2 %v2005_v16, %s1253_s17  ;;  %v316_v21 = vsel %vm149_vm4, %v1502_v23, %v310_v0  ;;  %v331_v0 = vadd.f32 %v315_v36, %v1590_v13 }
  0xbc   : > { %v215_v41 = vpop.permute.xlu1 %214  ;;  %v332_v17 = vadd.f32 %v316_v21, %v1502_v23 }
  0xbd   : > { %v220_v45 = vsel %vm149_vm4, %v1543_v46, %v215_v41  ;;  %v211_v12 = vpop.permute.xlu0 %210  ;;  %v2050_v60 = vpop.permute.xlu2 %407  ;;  %v329_v41 = vsel %vm150_vm5, %v1567_v62, %v324_v33  ;;  %v335_v33 = vadd.f32 %v331_v0, %v1590_v13 }
  0xbe   : > { %v218_v30 = vsel %vm149_vm4, %v1545_v48, %v211_v12  ;;  %v236_v8 = vadd.f32 %v220_v45, %v1543_v46  ;;  %v336_v25 = vadd.f32 %v332_v17, %v1502_v23 }
  0xbf   : > { %v234_v42 = vadd.f32 %v218_v30, %v1545_v48 }
  0xc0   : > { %v240_v56 = vadd.f32 %v236_v8, %v1543_v46  ;;  %v318_v8 = vsel %vm149_vm4, %v1523_v40, %v1860_v43 }
  0xc1   : > { %v238_v10 = vadd.f32 %v234_v42, %v1545_v48  ;;  %v884_v48 = vadd.f32 %v880_v63, %v1957_v54  ;;  %v2090_v54 = vadd.f32 %v885_v9, %v877_v37 }
  0xc2   : > { %890 = vrot.lane.b32.xlu1 %v2040_v53, %s1253_s17 }
  0xc3   : > { %v242_v57 = vadd.f32 %v238_v10, %v230_v32  ;;  %803 = vrot.lane.b32.xlu0 %v2048_v28, %s1253_s17  ;;  %892 = vrot.lane.b32.xlu2 %v2060_v59, %s1253_s17  ;;  %v2097_v51 = vadd.f32 %v884_v48, %v871_v58 }
  0xc4   : > { %v312_v20 = vpop.permute.xlu1 %311 }
  0xc5   : > { %v246_v3 = vmul.f32 0.015625, %v242_v57  ;;  %v317_v2 = vsel %vm149_vm4, %v1567_v62, %v312_v20  ;;  %v227_v14 = vpop.permute.xlu0 %226  ;;  %v418_v26 = vpop.permute.xlu2 %417 }
  0xc6   : > { %v333_v31 = vadd.f32 %v317_v2, %v1567_v62  ;;  %v232_v1 = vsel %vm150_vm5, %v1543_v46, %v227_v14  ;;  %v425_v36 = vsel %vm150_vm5, %v1626_v11, %v418_v26 }
  0xc7   : > { %250 = vst [vmem:[%s1995_s26] sm:$0xff] %v246_v3  ;;  %v244_v27 = vadd.f32 %v240_v56, %v232_v1 }
  0xc8   : > { %v337_v45 = vadd.f32 %v333_v31, %v1567_v62 }
  0xc9   : > { %v248_v12 = vmul.f32 0.015625, %v244_v27 }
  0xca   : > { %v341_v46 = vadd.f32 %v337_v45, %v329_v41  ;;  %896 = vrot.lane.b32.xlu1 %v2090_v54, %s1253_s17 }
  0xcb   : > { %252 = vst [vmem:[%s1995_s26 + $0x80] sm:$0xff] %v248_v12  ;;  %894 = vrot.lane.b32.xlu0 %v2097_v51, %s1253_s17  ;;  %809 = vrot.lane.b32.xlu2 %v1998_v61, %s1254_s25 }
  0xcc   : > { %v345_v34 = vmul.f32 0.015625, %v341_v46  ;;  %v322_v30 = vpop.permute.xlu1 %321 }
  0xcd   : > { %v328_v62 = vsel %vm150_vm5, %v1502_v23, %v322_v30  ;;  %v320_v35 = vpop.permute.xlu0 %319  ;;  %v424_v47 = vpop.permute.xlu2 %423  ;;  %v334_v23 = vadd.f32 %v318_v8, %v1523_v40 }
  0xce   : > { %1045 = vst [vmem:[%s1995_s26 + $0x90] sm:$0xff] %v345_v34  ;;  %v340_v42 = vadd.f32 %v336_v25, %v328_v62  ;;  %v327_v63 = vsel %vm150_vm5, %v1590_v13, %v320_v35  ;;  %v428_v27 = vsel %vm150_vm5, %v1660_v6, %v424_v47 }
  0xcf   : > { %v339_v32 = vadd.f32 %v335_v33, %v327_v63  ;;  %v338_v57 = vadd.f32 %v334_v23, %v1523_v40 }
  0xd0   : > { %v344_v10 = vmul.f32 0.015625, %v340_v42 }
  0xd1   : > { %v343_v9 = vmul.f32 0.015625, %v339_v32 }
  0xd2   : > { %1044 = vst [vmem:[%s1995_s26 + $0x18] sm:$0xff] %v344_v10  ;;  %813 = vrot.lane.b32.xlu1 %v2005_v16, %s1254_s25 }
  0xd3   : > { %1043 = vst [vmem:[%s1995_s26 + $0x10] sm:$0xff] %v343_v9  ;;  %811 = vrot.lane.b32.xlu0 %v1969_v22, %s1254_s25  ;;  %815 = vrot.lane.b32.xlu2 %v2048_v28, %s1254_s25 }
  0xd4   : > { %v406_v43 = vpop.permute.xlu1 %405 }
  0xd5   : > { %v413_v13 = vsel %vm149_vm4, %v1626_v11, %v406_v43  ;;  %v326_v56 = vpop.permute.xlu0 %325  ;;  %v508_v58 = vpop.permute.xlu2 %507 }
  0xd6   : > { %v429_v37 = vadd.f32 %v413_v13, %v1626_v11  ;;  %v330_v48 = vsel %vm150_vm5, %v1523_v40, %v326_v56 }
  0xd7   : > { %v342_v20 = vadd.f32 %v338_v57, %v330_v48 }
  0xd8   : > { %v433_v21 = vadd.f32 %v429_v37, %v1626_v11  ;;  %v414_v11 = vsel %vm149_vm4, %v1636_v38, %v2050_v60 }
  0xd9   : > { %v346_v3 = vmul.f32 0.015625, %v342_v20  ;;  %v430_v12 = vadd.f32 %v414_v11, %v1636_v38 }
  0xda   : > { %v437_v2 = vadd.f32 %v433_v21, %v425_v36  ;;  %904 = vrot.lane.b32.xlu1 %v2060_v59, %s1254_s25 }
  0xdb   : > { %1046 = vst [vmem:[%s1995_s26 + $0x98] sm:$0xff] %v346_v3  ;;  %902 = vrot.lane.b32.xlu0 %v2040_v53, %s1254_s25  ;;  %906 = vrot.lane.b32.xlu2 %v2097_v51, %s1254_s25  ;;  %v513_v3 = vsel %vm149_vm4, %v1730_v5, %v508_v58 }
  0xdc   : > { %v441_v14 = vmul.f32 0.015625, %v437_v2  ;;  %v412_v40 = vpop.permute.xlu1 %411 }
  0xdd   : > { %v416_v31 = vsel %vm149_vm4, %v1660_v6, %v412_v40  ;;  %v410_v1 = vpop.permute.xlu0 %409  ;;  %v518_v26 = vpop.permute.xlu2 %517 }
  0xde   : > { %1051 = vst [vmem:[%s1995_s26 + $0x20] sm:$0xff] %v441_v14  ;;  %v432_v0 = vadd.f32 %v416_v31, %v1660_v6  ;;  %v415_v41 = vsel %vm149_vm4, %v1662_v7, %v410_v1  ;;  %v529_v1 = vadd.f32 %v513_v3, %v1730_v5 }
  0xdf   : > { %v431_v45 = vadd.f32 %v415_v41, %v1662_v7 }
  0xe0   : > { %v436_v17 = vadd.f32 %v432_v0, %v1660_v6  ;;  %v434_v6 = vadd.f32 %v430_v12, %v1636_v38  ;;  %v533_v0 = vadd.f32 %v529_v1, %v1730_v5 }
  0xe1   : > { %v435_v34 = vadd.f32 %v431_v45, %v1662_v7 }
  0xe2   : > { %v440_v60 = vadd.f32 %v436_v17, %v428_v27 }
  0xe3   : > { %908 = vrot.lane.b32.xlu0 %v2090_v54, %s1254_s25 }
  0xe4   : > { %v444_v46 = vmul.f32 0.015625, %v440_v60  ;;  %v422_v33 = vpop.permute.xlu1 %421 }
  0xe5   : > { %v427_v30 = vsel %vm150_vm5, %v1662_v7, %v422_v33  ;;  %v420_v25 = vpop.permute.xlu0 %419  ;;  %v602_v42 = vpop.permute.xlu2 %601 }
  0xe6   : > { %1054 = vst [vmem:[%s1995_s26 + $0xa8] sm:$0xff] %v444_v46  ;;  %v439_v62 = vadd.f32 %v435_v34, %v427_v30  ;;  %v426_v35 = vsel %vm150_vm5, %v1636_v38, %v420_v25  ;;  %v524_v38 = vsel %vm150_vm5, %v1720_v49, %v518_v26  ;;  %v609_v34 = vsel %vm149_vm4, %v1780_v44, %v602_v42 }
  0xe7   : > { %v438_v8 = vadd.f32 %v434_v6, %v426_v35 }
  0xe8   : > { %v443_v63 = vmul.f32 0.015625, %v439_v62 }
  0xe9   : > { %v442_v32 = vmul.f32 0.015625, %v438_v8  ;;  %v625_v8 = vadd.f32 %v609_v34, %v1780_v44 }
  0xea   : > { %1053 = vst [vmem:[%s1995_s26 + $0xa0] sm:$0xff] %v443_v63 }
  0xeb   : > { %1052 = vst [vmem:[%s1995_s26 + $0x28] sm:$0xff] %v442_v32 }
  0xec   : > { %v506_v47 = vpop.permute.xlu1 %505 }
  0xed   : > { %v512_v7 = vsel %vm149_vm4, %v1720_v49, %v506_v47  ;;  %v504_v10 = vpop.permute.xlu0 %503  ;;  %v608_v43 = vpop.permute.xlu2 %607 }
  0xee   : > { %v528_v23 = vadd.f32 %v512_v7, %v1720_v49  ;;  %v511_v9 = vsel %vm149_vm4, %v1724_v50, %v504_v10  ;;  %v629_v10 = vadd.f32 %v625_v8, %v1780_v44 }
  0xef   : > { %v527_v57 = vadd.f32 %v511_v9, %v1724_v50 }
  0xf0   : > { %v532_v13 = vadd.f32 %v528_v23, %v1720_v49 }
  0xf1   : > { %v531_v36 = vadd.f32 %v527_v57, %v1724_v50 }
  0xf2   : > { %v536_v56 = vadd.f32 %v532_v13, %v524_v38 }
  0xf4   : > { %v540_v37 = vmul.f32 0.015625, %v536_v56  ;;  %v516_v48 = vpop.permute.xlu1 %515 }
  0xf5   : > { %v523_v20 = vsel %vm150_vm5, %v1724_v50, %v516_v48  ;;  %v510_v21 = vpop.permute.xlu0 %509  ;;  %v618_v14 = vpop.permute.xlu2 %617 }
  0xf6   : > { %1060 = vst [vmem:[%s1995_s26 + $0x38] sm:$0xff] %v540_v37  ;;  %v535_v2 = vadd.f32 %v531_v36, %v523_v20  ;;  %v514_v49 = vsel %vm149_vm4, %v1744_v15, %v510_v21  ;;  %v623_v6 = vsel %vm150_vm5, %v1798_v55, %v618_v14 }
  0xf7   : > { %v530_v31 = vadd.f32 %v514_v49, %v1744_v15 }
  0xf8   : > { %v539_v40 = vmul.f32 0.015625, %v535_v2 }
  0xf9   : > { %v534_v11 = vadd.f32 %v530_v31, %v1744_v15 }
  0xfa   : > { %1059 = vst [vmem:[%s1995_s26 + $0x30] sm:$0xff] %v539_v40 }
  0xfc   : > { %v522_v50 = vpop.permute.xlu1 %521 }
  0xfd   : > { %v526_v58 = vsel %vm150_vm5, %v1744_v15, %v522_v50  ;;  %v520_v41 = vpop.permute.xlu0 %519  ;;  %v702_v45 = vpop.permute.xlu2 %701 }
  0xfe   : > { %v538_v27 = vadd.f32 %v534_v11, %v526_v58  ;;  %v525_v26 = vsel %vm150_vm5, %v1730_v5, %v520_v41 }
  0xff   : > { %v537_v17 = vadd.f32 %v533_v0, %v525_v26 }
 0x100   : > { %v542_v12 = vmul.f32 0.015625, %v538_v27 }
 0x101   : > { %v541_v60 = vmul.f32 0.015625, %v537_v17 }
 0x102   : > { %1062 = vst [vmem:[%s1995_s26 + $0xb8] sm:$0xff] %v542_v12 }
 0x103   : > { %1061 = vst [vmem:[%s1995_s26 + $0xb0] sm:$0xff] %v541_v60 }
 0x104   : > { %v606_v46 = vpop.permute.xlu1 %605 }
 0x105   : > { %v611_v33 = vsel %vm149_vm4, %v1798_v55, %v606_v46  ;;  %v604_v15 = vpop.permute.xlu0 %603  ;;  %v712_v25 = vpop.permute.xlu2 %711 }
 0x106   : > { %v627_v30 = vadd.f32 %v611_v33, %v1798_v55  ;;  %v610_v5 = vsel %vm149_vm4, %v1808_v39, %v604_v15  ;;  %v719_v3 = vsel %vm150_vm5, %v1856_v52, %v712_v25 }
 0x107   : > { %v626_v35 = vadd.f32 %v610_v5, %v1808_v39 }
 0x108   : > { %v631_v62 = vadd.f32 %v627_v30, %v1798_v55  ;;  %v612_v55 = vsel %vm149_vm4, %v1812_v4, %v608_v43 }
 0x109   : > { %v630_v47 = vadd.f32 %v626_v35, %v1808_v39  ;;  %v628_v37 = vadd.f32 %v612_v55, %v1812_v4 }
 0x10a   : > { %v635_v63 = vadd.f32 %v631_v62, %v623_v6 }
 0x10b   : > { %v632_v36 = vadd.f32 %v628_v37, %v1812_v4 }
 0x10c   : > { %v639_v42 = vmul.f32 0.015625, %v635_v63  ;;  %v616_v32 = vpop.permute.xlu1 %615 }
 0x10d   : > { %v622_v7 = vsel %vm150_vm5, %v1808_v39, %v616_v32  ;;  %v614_v23 = vpop.permute.xlu0 %613  ;;  %v718_v57 = vpop.permute.xlu2 %717 }
 0x10e   : > { %1069 = vst [vmem:[%s1995_s26 + $0xc0] sm:$0xff] %v639_v42  ;;  %v634_v9 = vadd.f32 %v630_v47, %v622_v7  ;;  %v621_v38 = vsel %vm150_vm5, %v1780_v44, %v614_v23  ;;  %v722_v41 = vsel %vm150_vm5, %v1892_v29, %v718_v57 }
 0x10f   : > { %v633_v13 = vadd.f32 %v629_v10, %v621_v38 }
 0x110   : > { %v638_v56 = vmul.f32 0.015625, %v634_v9 }
 0x111   : > { %v637_v39 = vmul.f32 0.015625, %v633_v13 }
 0x112   : > { %1068 = vst [vmem:[%s1995_s26 + $0x48] sm:$0xff] %v638_v56 }
 0x113   : > { %1067 = vst [vmem:[%s1995_s26 + $0x40] sm:$0xff] %v637_v39 }
 0x114   : > { %v700_v48 = vpop.permute.xlu1 %699 }
 0x115   : > { %v707_v43 = vsel %vm149_vm4, %v1856_v52, %v700_v48  ;;  %v620_v20 = vpop.permute.xlu0 %619  ;;  %v802_v49 = vpop.permute.xlu2 %801 }
 0x116   : > { %v723_v44 = vadd.f32 %v707_v43, %v1856_v52  ;;  %v624_v21 = vsel %vm150_vm5, %v1812_v4, %v620_v20  ;;  %v708_v4 = vsel %vm149_vm4, %v1870_v24, %v702_v45  ;;  %v807_v37 = vsel %vm149_vm4, %v2005_v16, %v802_v49 }
 0x117   : > { %v636_v2 = vadd.f32 %v632_v36, %v624_v21  ;;  %v724_v45 = vadd.f32 %v708_v4, %v1870_v24 }
 0x118   : > { %v727_v14 = vadd.f32 %v723_v44, %v1856_v52  ;;  %v823_v44 = vadd.f32 %v807_v37, %v2005_v16 }
 0x119   : > { %v640_v40 = vmul.f32 0.015625, %v636_v2  ;;  %v728_v34 = vadd.f32 %v724_v45, %v1870_v24 }
 0x11a   : > { %v731_v31 = vadd.f32 %v727_v14, %v719_v3 }
 0x11b   : > { %1070 = vst [vmem:[%s1995_s26 + $0xc8] sm:$0xff] %v640_v40  ;;  %v827_v40 = vadd.f32 %v823_v44, %v2005_v16 }
 0x11c   : > { %v735_v1 = vmul.f32 0.015625, %v731_v31  ;;  %v706_v50 = vpop.permute.xlu1 %705 }
 0x11d   : > { %v710_v11 = vsel %vm149_vm4, %v1892_v29, %v706_v50  ;;  %v704_v58 = vpop.permute.xlu0 %703  ;;  %v893_v27 = vpop.permute.xlu2 %892 }
 0x11e   : > { %1075 = vst [vmem:[%s1995_s26 + $0x50] sm:$0xff] %v735_v1  ;;  %v726_v0 = vadd.f32 %v710_v11, %v1892_v29  ;;  %v709_v52 = vsel %vm149_vm4, %v1897_v19, %v704_v58  ;;  %v899_v31 = vsel %vm149_vm4, %v2060_v59, %v893_v27 }
 0x11f   : > { %v725_v17 = vadd.f32 %v709_v52, %v1897_v19 }
 0x120   : > { %v730_v26 = vadd.f32 %v726_v0, %v1892_v29 }
 0x121   : > { %v729_v33 = vadd.f32 %v725_v17, %v1897_v19 }
 0x122   : > { %v734_v12 = vadd.f32 %v730_v26, %v722_v41  ;;  %v915_v41 = vadd.f32 %v899_v31, %v2060_v59 }
 0x124   : > { %v738_v60 = vmul.f32 0.015625, %v734_v12  ;;  %v716_v46 = vpop.permute.xlu1 %715  ;;  %v919_v45 = vadd.f32 %v915_v41, %v2060_v59 }
 0x125   : > { %v721_v15 = vsel %vm150_vm5, %v1897_v19, %v716_v46  ;;  %v714_v30 = vpop.permute.xlu0 %713  ;;  %v810_v35 = vpop.permute.xlu2 %809 }
 0x126   : > { %1078 = vst [vmem:[%s1995_s26 + $0xd8] sm:$0xff] %v738_v60  ;;  %v733_v29 = vadd.f32 %v729_v33, %v721_v15  ;;  %v720_v5 = vsel %vm150_vm5, %v1870_v24, %v714_v30  ;;  %v817_v32 = vsel %vm150_vm5, %v1998_v61, %v810_v35 }
 0x127   : > { %v732_v6 = vadd.f32 %v728_v34, %v720_v5 }
 0x128   : > { %v737_v25 = vmul.f32 0.015625, %v733_v29 }
 0x129   : > { %v736_v62 = vmul.f32 0.015625, %v732_v6 }
 0x12a   : > { %1077 = vst [vmem:[%s1995_s26 + $0xd0] sm:$0xff] %v737_v25 }
 0x12b   : > { %1076 = vst [vmem:[%s1995_s26 + $0x58] sm:$0xff] %v736_v62 }
 0x12c   : > { %v800_v8 = vpop.permute.xlu1 %799 }
 0x12d   : > { %v798_v63 = vpop.permute.xlu0 %797  ;;  %v816_v7 = vpop.permute.xlu2 %815  ;;  %v806_v36 = vsel %vm149_vm4, %v1969_v22, %v800_v8 }
 0x12e   : > { %v805_v19 = vsel %vm149_vm4, %v1998_v61, %v798_v63  ;;  %v820_v13 = vsel %vm150_vm5, %v2048_v28, %v816_v7  ;;  %v822_v3 = vadd.f32 %v806_v36, %v1969_v22 }
 0x12f   : > { %v821_v42 = vadd.f32 %v805_v19, %v1998_v61 }
 0x130   : > { %v826_v11 = vadd.f32 %v822_v3, %v1969_v22 }
 0x131   : > { %v825_v24 = vadd.f32 %v821_v42, %v1998_v61 }
 0x133   : > { %v829_v47 = vadd.f32 %v825_v24, %v817_v32 }
 0x134   : > { %v891_v10 = vpop.permute.xlu1 %890 }
 0x135   : > { %v833_v23 = vmul.f32 0.015625, %v829_v47  ;;  %v804_v55 = vpop.permute.xlu0 %803  ;;  %v907_v43 = vpop.permute.xlu2 %906 }
 0x136   : > { %v808_v9 = vsel %vm149_vm4, %v2048_v28, %v804_v55  ;;  %v912_v21 = vsel %vm150_vm5, %v2097_v51, %v907_v43 }
 0x137   : > { %1083 = vst [vmem:[%s1995_s26 + $0x60] sm:$0xff] %v833_v23  ;;  %v824_v38 = vadd.f32 %v808_v9, %v2048_v28 }
 0x139   : > { %v828_v57 = vadd.f32 %v824_v38, %v2048_v28 }
 0x13b   : > { %v832_v61 = vadd.f32 %v828_v57, %v820_v13 }
 0x13c   : > { %v897_v56 = vpop.permute.xlu1 %896 }
 0x13d   : > { %v836_v39 = vmul.f32 0.015625, %v832_v61  ;;  %v895_v48 = vpop.permute.xlu0 %894  ;;  %v901_v46 = vsel %vm149_vm4, %v2090_v54, %v897_v56 }
 0x13e   : > { %v900_v20 = vsel %vm149_vm4, %v2097_v51, %v895_v48 }
 0x13f   : > { %1086 = vst [vmem:[%s1995_s26 + $0xe8] sm:$0xff] %v836_v39  ;;  %v916_v28 = vadd.f32 %v900_v20, %v2097_v51 }
 0x141   : > { %v920_v2 = vadd.f32 %v916_v28, %v2097_v51  ;;  %v898_v51 = vsel %vm149_vm4, %v2040_v53, %v891_v10 }
 0x143   : > { %v924_v49 = vadd.f32 %v920_v2, %v912_v21 }
 0x144   : > { %v814_v14 = vpop.permute.xlu1 %813 }
 0x145   : > { %v928_v1 = vmul.f32 0.015625, %v924_v49  ;;  %v819_v50 = vsel %vm150_vm5, %v2005_v16, %v814_v14  ;;  %v812_v58 = vpop.permute.xlu0 %811  ;;  %v914_v16 = vadd.f32 %v898_v51, %v2040_v53 }
 0x146   : > { %v831_v4 = vadd.f32 %v827_v40, %v819_v50  ;;  %v818_v0 = vsel %vm150_vm5, %v1969_v22, %v812_v58 }
 0x147   : > { %1089 = vst [vmem:[%s1995_s26 + $0xf0] sm:$0xff] %v928_v1  ;;  %v830_v52 = vadd.f32 %v826_v11, %v818_v0  ;;  %v918_v12 = vadd.f32 %v914_v16, %v2040_v53 }
 0x148   : > { %v835_v27 = vmul.f32 0.015625, %v831_v4 }
 0x149   : > { %v834_v26 = vmul.f32 0.015625, %v830_v52 }
 0x14a   : > { %1085 = vst [vmem:[%s1995_s26 + $0xe0] sm:$0xff] %v835_v27 }
 0x14b   : > { %1084 = vst [vmem:[%s1995_s26 + $0x68] sm:$0xff] %v834_v26 }
 0x14c   : > { %v905_v17 = vpop.permute.xlu1 %904 }
 0x14d   : > { %v911_v22 = vsel %vm150_vm5, %v2060_v59, %v905_v17  ;;  %v903_v60 = vpop.permute.xlu0 %902  ;;  %v917_v59 = vadd.f32 %v901_v46, %v2090_v54 }
 0x14e   : > { %v923_v33 = vadd.f32 %v919_v45, %v911_v22  ;;  %v910_v15 = vsel %vm150_vm5, %v2040_v53, %v903_v60 }
 0x14f   : > { %v922_v34 = vadd.f32 %v918_v12, %v910_v15  ;;  %v921_v5 = vadd.f32 %v917_v59, %v2090_v54 }
 0x150   : > { %v927_v30 = vmul.f32 0.015625, %v923_v33 }
 0x151   : > { %v926_v29 = vmul.f32 0.015625, %v922_v34 }
 0x152   : > { %1088 = vst [vmem:[%s1995_s26 + $0x78] sm:$0xff] %v927_v30 }
 0x153   : > { %1087 = vst [vmem:[%s1995_s26 + $0x70] sm:$0xff] %v926_v29 }
 0x155   : > { %v909_v6 = vpop.permute.xlu0 %908 }
 0x156   : > { %v913_v53 = vsel %vm150_vm5, %v2090_v54, %v909_v6 }
 0x157   : > { %v925_v25 = vadd.f32 %v921_v5, %v913_v53 }
 0x159   : > { %v929_v62 = vmul.f32 0.015625, %v925_v25 }
 0x15b   : > { %1090 = vst [vmem:[%s1995_s26 + $0xf8] sm:$0xff] %v929_v62 }
 0x15c   : > { %1210 = shalt.err (!%p1207_p4)
}
 0x15d   : > { %s1255_s21 = smov 128   ;;  %s1256_s22 = smov 8  }
 0x15e   : > { %1103 = dma.vmem_to_hbm [thread:$0]  (%p1316_p10), %s950_s2, 4096, %s952_s3, %s936_s10, %s1255_s21, %s1255_s21, %s1256_s22  }
 0x15f PF: > { %p1114_p5 = scmp.ge.s32.totalorder %s1249_s9, 2  ;;  %s966_s23 = sand.u32 1, %s1237_s6  }
 0x160   : > { %s967_s24 = scalar_lea.sflag [#allocation4], %s966_s23 }
 0x161   : > { %p1110_p7 = pnand %p1114_p5, %p1320_p11 }
 0x163   : > { %p1111_p8 = pneg %p1110_p7 }
 0x165   : > { %1232 = dma.done.wait (%p1111_p8), %s967_s24, 4096  }
 0x166   : > { %1234 = vsyncadd (%p1111_p8), %s967_s24, 4294963200  ;;  %p14_p9 = scmp.ge.s32.totalorder %s1292_s12, 6   ;;  %s2400_s6 = smov %s1241_s7 }
 0x167   : > { %s2401_s7 = smov %s1245_s8  ;;  %s2402_s8 = smov %s1304_s15 }
 0x168   : > { %s2403_s9 = smov %s1292_s12  ;;  %16 = sbr.rel (!%p14_p9) target bundleno = 5 (0x5), region = 83 }
 0x16d   :  { %973 = vsyncpa [#allocation3], 1 }
 0x16e   :  { %975 = vsyncpa [#allocation3 + $0x1], 1 }
 0x16f   :  { %976 = vsyncpa [#allocation4], 1 }
 0x170   :  { %978 = vsyncpa [#allocation4 + $0x1], 1 }

</bundles_post_ra>
